<compile_context>
chip_gen: v5e
topology: v5e:2x2
jax: 0.10.0
libtpu: 0.0.40
codegen_flags: <defaults>
</compile_context>

<pallas_src>
import functools

import jax
import jax.numpy as jnp
from jax import lax
from jax.experimental import pallas as pl
from jax.experimental.pallas import tpu as pltpu

POS_IOU = 0.7
NEG_IOU = 0.3
_EPS = 1e-6


def _rpn_loss_kernel(prop_ref,   # VMEM (4, N, Pt) f32  proposal coords x1,y1,x2,y2 (plane per row)
                     delt_ref,   # VMEM (4, N, Pt) f32  predicted deltas dx,dy,dw,dh
                     cls_ref,    # VMEM (N, Pt)    f32  objectness logit (channel 1)
                     gtf_ref,    # VMEM (G, N, 8)  f32  per-GT features [x1,y1,x2,y2,cx,cy,log w,log h]
                     gtv_ref,    # VMEM (G, N, 1)  f32  1.0 where GT row g is a real box
                     out_ref,    # out  (4, Pt)    f32  rows: [bce sum, labeled cnt, sl1 sum, pos cnt]
                     *, g_count, pt, p_actual):
    f32 = jnp.float32

    # ---- per-anchor 2-D planes (N on sublanes, Pt on lanes: no sublane waste) ----
    px1 = prop_ref[0]
    py1 = prop_ref[1]
    px2 = prop_ref[2]
    py2 = prop_ref[3]                                   # (N, Pt)
    pw = px2 - px1
    ph = py2 - py1
    area_p = pw * ph                                    # (N, Pt)

    gtf = gtf_ref[...]                                  # (G, N, 8)  (tiny)
    gtv = gtv_ref[...]                                  # (G, N, 1)

    # ---- IoU + best-match gather: unrolled over the small static G axis ----
    # Only (N, Pt) planes stay live; strict ">" keeps the FIRST maximum, matching
    # argmax(first-occurrence) semantics of the reference.
    max_iou = jnp.full_like(area_p, -1.0)
    zero = jnp.zeros_like(area_p)
    mgcx = zero
    mgcy = zero
    mlgw = zero
    mlgh = zero
    for g in range(g_count):
        feat = gtf[g]                                   # (N, 8)
        vmask = gtv[g] > 0.0                            # (N, 1)
        gx1 = feat[:, 0:1]
        gy1 = feat[:, 1:2]
        gx2 = feat[:, 2:3]
        gy2 = feat[:, 3:4]
        ix1 = jnp.maximum(px1, gx1)
        iy1 = jnp.maximum(py1, gy1)
        ix2 = jnp.minimum(px2, gx2)
        iy2 = jnp.minimum(py2, gy2)
        inter = jnp.maximum(ix2 - ix1, 0.0) * jnp.maximum(iy2 - iy1, 0.0)
        area_g = (gx2 - gx1) * (gy2 - gy1)              # (N, 1)
        union = jnp.maximum(area_p + area_g - inter, _EPS)
        iou_g = jnp.where(vmask, inter / union, -1.0)   # (N, Pt); padded GT rows never win
        better = iou_g > max_iou
        max_iou = jnp.where(better, iou_g, max_iou)
        mgcx = jnp.where(better, feat[:, 4:5], mgcx)    # matched gt center / log-size
        mgcy = jnp.where(better, feat[:, 5:6], mgcy)
        mlgw = jnp.where(better, feat[:, 6:7], mlgw)
        mlgh = jnp.where(better, feat[:, 7:8], mlgh)

    # ---- labels, with the padded anchor-lane tail masked via iota (no extra input) ----
    lane = lax.broadcasted_iota(jnp.int32, max_iou.shape, 1) + pl.program_id(0) * pt
    in_range = lane < p_actual
    pos = jnp.logical_and(max_iou > POS_IOU, in_range)
    neg = jnp.logical_and(jnp.logical_and(max_iou < NEG_IOU, max_iou >= 0.0), in_range)
    labeled = jnp.logical_or(pos, neg)
    labels = jnp.where(pos, 1.0, 0.0)

    # ---- objectness: BCE-with-logits on the channel-1 score ----
    x = cls_ref[...]                                    # (N, Pt)
    bce = jnp.maximum(x, 0.0) - x * labels + jnp.log(1.0 + jnp.exp(-jnp.abs(x)))

    # ---- regression targets (standard Faster-RCNN encoding), per-anchor planes ----
    pw_c = jnp.maximum(pw, _EPS)
    ph_c = jnp.maximum(ph, _EPS)
    pcx = px1 + 0.5 * pw
    pcy = py1 + 0.5 * ph
    tx = (mgcx - pcx) / pw_c
    ty = (mgcy - pcy) / ph_c
    tw = mlgw - jnp.log(pw_c)
    th = mlgh - jnp.log(ph_c)

    def smooth_l1(d, t):
        diff = d - t
        ad = jnp.abs(diff)
        return jnp.where(ad < 1.0, 0.5 * diff * diff, ad - 0.5)

    sl1 = (smooth_l1(delt_ref[0], tx) + smooth_l1(delt_ref[1], ty)
           + smooth_l1(delt_ref[2], tw) + smooth_l1(delt_ref[3], th))   # (N, Pt)

    posf = pos.astype(f32)
    bce_row = jnp.sum(jnp.where(labeled, bce, 0.0), axis=0, keepdims=True)   # (1, Pt)
    cnt_row = jnp.sum(labeled.astype(f32), axis=0, keepdims=True)
    sl1_row = jnp.sum(sl1 * posf, axis=0, keepdims=True)
    pos_row = jnp.sum(posf, axis=0, keepdims=True)
    # single packed lane-dense output block -> one writeback per step
    out_ref[...] = jnp.concatenate([bce_row, cnt_row, sl1_row, pos_row], axis=0)


def rpn_loss(cls_scores, bbox_deltas, proposals, ref_boxes, ref_counts, *, pt_lanes=None):
    """cls_scores (N,P,2), bbox_deltas (N,P,4), proposals (N,P,4),
    ref_boxes (N,G,4) zero-padded, ref_counts (N,) int32.
    pt_lanes: anchors per grid step (multiple of 128); None = auto."""
    N, P, _ = proposals.shape
    G = ref_boxes.shape[1]
    f32 = jnp.float32

    if pt_lanes is None:
        # keep each (N, Pt) plane around <= ~2048 elems (~2 vregs) so the ~20 live
        # planes stay well inside the 64-vreg file while amortizing per-step overhead.
        r_total = -(-P // 128)
        budget = max(1, 2048 // (128 * max(N, 1)))
        pt_lanes = 128 * max(1, min(r_total, budget))
    pt = int(pt_lanes)
    assert pt % 128 == 0
    p_pad = -(-P // pt) * pt
    n_p = p_pad // pt

    # ---- coordinate-first layout prep (layout plumbing, not compute) ----
    # TODO(synk): produce these planes upstream (or fuse via allow_input_fusion) so the
    # transposes below stop costing an extra HBM round-trip at realistic anchor counts.
    cls_plane = cls_scores[:, :, 1].astype(f32)                     # (N, P)
    prop_t = jnp.transpose(proposals.astype(f32), (2, 0, 1))        # (4, N, P)
    delt_t = jnp.transpose(bbox_deltas.astype(f32), (2, 0, 1))      # (4, N, P)
    if p_pad != P:
        cls_plane = jnp.pad(cls_plane, ((0, 0), (0, p_pad - P)))
        prop_t = jnp.pad(prop_t, ((0, 0), (0, 0), (0, p_pad - P)))
        delt_t = jnp.pad(delt_t, ((0, 0), (0, 0), (0, p_pad - P)))

    # ---- per-GT features precomputed once (G << P) ----
    gt = ref_boxes.astype(f32)                                      # (N, G, 4)
    gx1, gy1, gx2, gy2 = gt[..., 0], gt[..., 1], gt[..., 2], gt[..., 3]
    gw = gx2 - gx1
    gh = gy2 - gy1
    gt_feat = jnp.stack([gx1, gy1, gx2, gy2,
                         gx1 + 0.5 * gw, gy1 + 0.5 * gh,
                         jnp.log(jnp.maximum(gw, _EPS)),
                         jnp.log(jnp.maximum(gh, _EPS))], axis=-1)  # (N, G, 8)
    gt_feat = jnp.transpose(gt_feat, (1, 0, 2))                     # (G, N, 8)
    gt_valid = (jnp.arange(G)[:, None] < ref_counts[None, :]).astype(f32)[..., None]  # (G,N,1)

    kernel = functools.partial(_rpn_loss_kernel, g_count=G, pt=pt, p_actual=P)

    out = pl.pallas_call(
        kernel,
        out_shape=jax.ShapeDtypeStruct((4, p_pad), f32),
        grid_spec=pltpu.PrefetchScalarGridSpec(
            num_scalar_prefetch=0,
            grid=(n_p,),
            in_specs=[
                pl.BlockSpec((4, N, pt), lambda p: (0, 0, p)),   # proposals (coord-first)
                pl.BlockSpec((4, N, pt), lambda p: (0, 0, p)),   # deltas (coord-first)
                pl.BlockSpec((N, pt), lambda p: (0, p)),         # objectness logit
                pl.BlockSpec((G, N, 8), lambda p: (0, 0, 0)),    # per-GT features (whole array)
                pl.BlockSpec((G, N, 1), lambda p: (0, 0, 0)),    # per-GT valid mask
            ],
            out_specs=pl.BlockSpec((4, pt), lambda p: (0, p)),
        ),
        compiler_params=pltpu.CompilerParams(dimension_semantics=("parallel",)),
    )(prop_t, delt_t, cls_plane, gt_feat, gt_valid)

    # tiny final reduction / divides in plain JAX (keeps the grid axis truly parallel)
    bce_sum = jnp.sum(out[0])
    mask_n = jnp.sum(out[1])
    sl1_sum = jnp.sum(out[2])
    pos_n = jnp.sum(out[3])
    obj = jnp.where(mask_n > 0.0, bce_sum / jnp.maximum(mask_n, 1.0), 0.0)
    bbox = jnp.where(pos_n > 0.0, sl1_sum / jnp.maximum(4.0 * pos_n, 1.0), 0.0)
    return obj + bbox, obj, bbox


def rpn_loss_ref(cls_scores, bbox_deltas, proposals, ref_boxes, ref_counts):
    """Pure-JAX reference (same semantics as the PyTorch module)."""
    N, P, _ = proposals.shape
    G = ref_boxes.shape[1]
    p = proposals.astype(jnp.float32)
    g = ref_boxes.astype(jnp.float32)

    ix1 = jnp.maximum(p[:, :, None, 0], g[:, None, :, 0])
    iy1 = jnp.maximum(p[:, :, None, 1], g[:, None, :, 1])
    ix2 = jnp.minimum(p[:, :, None, 2], g[:, None, :, 2])
    iy2 = jnp.minimum(p[:, :, None, 3], g[:, None, :, 3])
    inter = jnp.maximum(ix2 - ix1, 0.0) * jnp.maximum(iy2 - iy1, 0.0)
    ap = (p[:, :, 2] - p[:, :, 0]) * (p[:, :, 3] - p[:, :, 1])
    ag = (g[:, :, 2] - g[:, :, 0]) * (g[:, :, 3] - g[:, :, 1])
    iou = inter / (ap[:, :, None] + ag[:, None, :] - inter)
    valid_g = jnp.arange(G)[None, None, :] < ref_counts[:, None, None]
    iou = jnp.where(valid_g, iou, -1.0)

    max_iou = iou.max(-1)
    argmax = iou.argmax(-1)
    pos = max_iou > POS_IOU
    neg = jnp.logical_and(max_iou < NEG_IOU, max_iou >= 0.0)
    validm = jnp.logical_or(pos, neg)

    x = cls_scores[:, :, 1].astype(jnp.float32)
    lab = pos.astype(jnp.float32)
    bce = jnp.maximum(x, 0.0) - x * lab + jnp.log(1.0 + jnp.exp(-jnp.abs(x)))
    mask_n = validm.astype(jnp.float32).sum()
    obj = jnp.where(mask_n > 0,
                    jnp.where(validm, bce, 0.0).sum() / jnp.maximum(mask_n, 1.0), 0.0)

    mg = jnp.take_along_axis(g, jnp.broadcast_to(argmax[:, :, None], (N, P, 4)), axis=1)
    pw = p[:, :, 2] - p[:, :, 0]; ph = p[:, :, 3] - p[:, :, 1]
    pcx = p[:, :, 0] + 0.5 * pw; pcy = p[:, :, 1] + 0.5 * ph
    gw = mg[:, :, 2] - mg[:, :, 0]; gh = mg[:, :, 3] - mg[:, :, 1]
    gcx = mg[:, :, 0] + 0.5 * gw; gcy = mg[:, :, 1] + 0.5 * gh
    t = jnp.stack([(gcx - pcx) / pw, (gcy - pcy) / ph,
                   jnp.log(gw / pw), jnp.log(gh / ph)], axis=-1)
    diff = bbox_deltas.astype(jnp.float32) - t
    ad = jnp.abs(diff)
    sl1 = jnp.where(ad < 1.0, 0.5 * diff * diff, ad - 0.5).sum(-1)
    pos_n = pos.astype(jnp.float32).sum()
    bbox = jnp.where(pos_n > 0,
                     jnp.where(pos, sl1, 0.0).sum() / jnp.maximum(4.0 * pos_n, 1.0), 0.0)
    return obj + bbox, obj, bbox


def _make_inputs(key, N, P, G, ref_counts):
    k1, k2, k3, k4, k5, k6, k7 = jax.random.split(key, 7)

    # ground-truth boxes (zero-padded beyond ref_counts)
    gxy = jax.random.uniform(k1, (N, G, 2), minval=0.0, maxval=48.0)
    gwh = jax.random.uniform(k2, (N, G, 2), minval=8.0, maxval=24.0)
    ref_boxes = jnp.concatenate([gxy, gxy + gwh], axis=-1)
    g_valid = (jnp.arange(G)[None, :] < ref_counts[:, None])[..., None]
    ref_boxes = ref_boxes * g_valid

    # proposals: random boxes, first few overwritten by jittered gt boxes so that
    # positive (IoU > 0.7) anchors exist and the bbox-loss path is exercised.
    pxy = jax.random.uniform(k3, (N, P, 2), minval=0.0, maxval=48.0)
    pwh = jax.random.uniform(k4, (N, P, 2), minval=4.0, maxval=20.0)
    proposals = jnp.concatenate([pxy, pxy + pwh], axis=-1)
    jitter = jax.random.uniform(k5, (N, G, 4), minval=-0.5, maxval=0.5)
    prop_head = jnp.where(g_valid, ref_boxes + jitter, proposals[:, :G, :])
    proposals = proposals.at[:, :G, :].set(prop_head)

    cls_scores = jax.random.normal(k6, (N, P, 2), dtype=jnp.float32)
    bbox_deltas = 0.1 * jax.random.normal(k7, (N, P, 4), dtype=jnp.float32)
    return cls_scores, bbox_deltas, proposals, ref_boxes, ref_counts


def _check(case_key, N, P, G, counts, pt_lanes=None):
    cls_scores, bbox_deltas, proposals, ref_boxes, ref_counts = _make_inputs(
        case_key, N, P, G, counts)
    total, obj, bbox = rpn_loss(cls_scores, bbox_deltas, proposals, ref_boxes,
                                ref_counts, pt_lanes=pt_lanes)
    jax.block_until_ready((total, obj, bbox))
    t_ref, o_ref, b_ref = rpn_loss_ref(cls_scores, bbox_deltas, proposals,
                                       ref_boxes, ref_counts)
    assert jnp.allclose(total, t_ref, atol=1e-4, rtol=1e-4), (total, t_ref)
    assert jnp.allclose(obj, o_ref, atol=1e-4, rtol=1e-4), (obj, o_ref)
    assert jnp.allclose(bbox, b_ref, atol=1e-4, rtol=1e-4), (bbox, b_ref)


if __name__ == "__main__":
    key = jax.random.PRNGKey(0)
    k_a, k_b, k_c = jax.random.split(key, 3)

    # case 1: small batch, single grid step, auto tile size
    _check(k_a, N=2, P=128, G=8, counts=jnp.array([3, 5], dtype=jnp.int32))

    # case 2: odd batch size + an empty-reference image (all anchors ignored there)
    _check(k_b, N=5, P=128, G=8,
           counts=jnp.array([3, 5, 0, 2, 4], dtype=jnp.int32))

    # case 3: P not a multiple of the tile -> multiple parallel grid steps + padded
    # anchor-lane tail masked in-kernel; also exercises a mid-batch empty image.
    _check(k_c, N=3, P=300, G=5,
           counts=jnp.array([2, 0, 5], dtype=jnp.int32), pt_lanes=128)

    print("KERNEL_OK")
</pallas_src>

<mosaic_0001>
module attributes {stable_mosaic.version = 11 : i64} {
  func.func @_rpn_loss_kernel(%arg0: i32, %arg1: memref<4x2x128xf32, #tpu.memory_space<vmem>>, %arg2: memref<4x2x128xf32, #tpu.memory_space<vmem>>, %arg3: memref<2x128xf32, #tpu.memory_space<vmem>>, %arg4: memref<8x2x8xf32, #tpu.memory_space<vmem>>, %arg5: memref<8x2x1xf32, #tpu.memory_space<vmem>>, %arg6: memref<4x128xf32, #tpu.memory_space<vmem>>) attributes {dimension_semantics = [#tpu.dimension_semantics<parallel>], iteration_bounds = array<i64: 1>, scalar_prefetch = 0 : i64, scratch_operands = 0 : i64, tpu.core_type = #tpu.core_type<tc>, window_params = [{transform_indices = @transform_0, window_bounds = array<i64: 4, 2, 128>}, {transform_indices = @transform_1, window_bounds = array<i64: 4, 2, 128>}, {transform_indices = @transform_2, window_bounds = array<i64: 2, 128>}, {pipeline_mode = #tpu.pipeline_mode<synchronous>, transform_indices = @transform_3, window_bounds = array<i64: 8, 2, 8>}, {pipeline_mode = #tpu.pipeline_mode<synchronous>, transform_indices = @transform_4, window_bounds = array<i64: 8, 2, 1>}, {transform_indices = @transform_5, window_bounds = array<i64: 4, 128>}]} {
    %c0 = arith.constant 0 : index
    %c0_0 = arith.constant 0 : index
    %c0_1 = arith.constant 0 : index
    %0 = vector.load %arg1[%c0, %c0_0, %c0_1] : memref<4x2x128xf32, #tpu.memory_space<vmem>>, vector<1x2x128xf32>
    %1 = vector.shape_cast %0 : vector<1x2x128xf32> to vector<2x128xf32>
    %c1 = arith.constant 1 : index
    %c0_2 = arith.constant 0 : index
    %c0_3 = arith.constant 0 : index
    %2 = vector.load %arg1[%c1, %c0_2, %c0_3] : memref<4x2x128xf32, #tpu.memory_space<vmem>>, vector<1x2x128xf32>
    %3 = vector.shape_cast %2 : vector<1x2x128xf32> to vector<2x128xf32>
    %c2 = arith.constant 2 : index
    %c0_4 = arith.constant 0 : index
    %c0_5 = arith.constant 0 : index
    %4 = vector.load %arg1[%c2, %c0_4, %c0_5] : memref<4x2x128xf32, #tpu.memory_space<vmem>>, vector<1x2x128xf32>
    %5 = vector.shape_cast %4 : vector<1x2x128xf32> to vector<2x128xf32>
    %c3 = arith.constant 3 : index
    %c0_6 = arith.constant 0 : index
    %c0_7 = arith.constant 0 : index
    %6 = vector.load %arg1[%c3, %c0_6, %c0_7] : memref<4x2x128xf32, #tpu.memory_space<vmem>>, vector<1x2x128xf32>
    %7 = vector.shape_cast %6 : vector<1x2x128xf32> to vector<2x128xf32>
    %8 = arith.subf %5, %1 : vector<2x128xf32>
    %9 = arith.subf %7, %3 : vector<2x128xf32>
    %10 = arith.mulf %8, %9 : vector<2x128xf32>
    %c0_8 = arith.constant 0 : index
    %c0_9 = arith.constant 0 : index
    %c0_10 = arith.constant 0 : index
    %11 = vector.load %arg4[%c0_8, %c0_9, %c0_10] : memref<8x2x8xf32, #tpu.memory_space<vmem>>, vector<8x2x8xf32>
    %c0_11 = arith.constant 0 : index
    %c0_12 = arith.constant 0 : index
    %c0_13 = arith.constant 0 : index
    %12 = vector.load %arg5[%c0_11, %c0_12, %c0_13] : memref<8x2x1xf32, #tpu.memory_space<vmem>>, vector<8x2x1xf32>
    %cst = arith.constant -1.000000e+00 : f32
    %13 = vector.broadcast %cst : f32 to vector<2x128xf32>
    %cst_14 = arith.constant 0.000000e+00 : f32
    %14 = vector.broadcast %cst_14 : f32 to vector<2x128xf32>
    %15 = vector.extract_strided_slice %11 {offsets = [0, 0, 0], sizes = [1, 2, 8], strides = [1, 1, 1]} : vector<8x2x8xf32> to vector<1x2x8xf32>
    %16 = vector.shape_cast %15 : vector<1x2x8xf32> to vector<2x8xf32>
    %17 = vector.extract_strided_slice %12 {offsets = [0, 0, 0], sizes = [1, 2, 1], strides = [1, 1, 1]} : vector<8x2x1xf32> to vector<1x2x1xf32>
    %18 = vector.shape_cast %17 : vector<1x2x1xf32> to vector<2x1xf32>
    %cst_15 = arith.constant 0.000000e+00 : f32
    %19 = vector.broadcast %cst_15 : f32 to vector<2x1xf32>
    %20 = arith.cmpf ogt, %18, %19 : vector<2x1xf32>
    %21 = vector.extract_strided_slice %16 {offsets = [0, 0], sizes = [2, 1], strides = [1, 1]} : vector<2x8xf32> to vector<2x1xf32>
    %22 = vector.extract_strided_slice %16 {offsets = [0, 1], sizes = [2, 1], strides = [1, 1]} : vector<2x8xf32> to vector<2x1xf32>
    %23 = vector.extract_strided_slice %16 {offsets = [0, 2], sizes = [2, 1], strides = [1, 1]} : vector<2x8xf32> to vector<2x1xf32>
    %24 = vector.extract_strided_slice %16 {offsets = [0, 3], sizes = [2, 1], strides = [1, 1]} : vector<2x8xf32> to vector<2x1xf32>
    %25 = vector.broadcast %21 : vector<2x1xf32> to vector<2x128xf32>
    %26 = arith.maximumf %1, %25 : vector<2x128xf32>
    %27 = vector.broadcast %22 : vector<2x1xf32> to vector<2x128xf32>
    %28 = arith.maximumf %3, %27 : vector<2x128xf32>
    %29 = vector.broadcast %23 : vector<2x1xf32> to vector<2x128xf32>
    %30 = arith.minimumf %5, %29 : vector<2x128xf32>
    %31 = vector.broadcast %24 : vector<2x1xf32> to vector<2x128xf32>
    %32 = arith.minimumf %7, %31 : vector<2x128xf32>
    %33 = arith.subf %30, %26 : vector<2x128xf32>
    %cst_16 = arith.constant 0.000000e+00 : f32
    %34 = vector.broadcast %cst_16 : f32 to vector<2x128xf32>
    %35 = arith.maximumf %33, %34 : vector<2x128xf32>
    %36 = arith.subf %32, %28 : vector<2x128xf32>
    %cst_17 = arith.constant 0.000000e+00 : f32
    %37 = vector.broadcast %cst_17 : f32 to vector<2x128xf32>
    %38 = arith.maximumf %36, %37 : vector<2x128xf32>
    %39 = arith.mulf %35, %38 : vector<2x128xf32>
    %40 = arith.subf %23, %21 : vector<2x1xf32>
    %41 = arith.subf %24, %22 : vector<2x1xf32>
    %42 = arith.mulf %40, %41 : vector<2x1xf32>
    %43 = vector.broadcast %42 : vector<2x1xf32> to vector<2x128xf32>
    %44 = arith.addf %10, %43 : vector<2x128xf32>
    %45 = arith.subf %44, %39 : vector<2x128xf32>
    %cst_18 = arith.constant 9.99999997E-7 : f32
    %46 = vector.broadcast %cst_18 : f32 to vector<2x128xf32>
    %47 = arith.maximumf %45, %46 : vector<2x128xf32>
    %48 = arith.divf %39, %47 : vector<2x128xf32>
    %cst_19 = arith.constant -1.000000e+00 : f32
    %49 = vector.shape_cast %20 : vector<2x1xi1> to vector<2x1xi1>
    %50 = vector.broadcast %49 : vector<2x1xi1> to vector<2x128xi1>
    %51 = vector.broadcast %cst_19 : f32 to vector<2x128xf32>
    %52 = arith.select %50, %48, %51 : vector<2x128xi1>, vector<2x128xf32>
    %53 = arith.cmpf ogt, %52, %13 : vector<2x128xf32>
    %54 = arith.select %53, %52, %13 : vector<2x128xi1>, vector<2x128xf32>
    %55 = vector.extract_strided_slice %16 {offsets = [0, 4], sizes = [2, 1], strides = [1, 1]} : vector<2x8xf32> to vector<2x1xf32>
    %56 = vector.shape_cast %55 : vector<2x1xf32> to vector<2x1xf32>
    %57 = vector.broadcast %56 : vector<2x1xf32> to vector<2x128xf32>
    %58 = arith.select %53, %57, %14 : vector<2x128xi1>, vector<2x128xf32>
    %59 = vector.extract_strided_slice %16 {offsets = [0, 5], sizes = [2, 1], strides = [1, 1]} : vector<2x8xf32> to vector<2x1xf32>
    %60 = vector.shape_cast %59 : vector<2x1xf32> to vector<2x1xf32>
    %61 = vector.broadcast %60 : vector<2x1xf32> to vector<2x128xf32>
    %62 = arith.select %53, %61, %14 : vector<2x128xi1>, vector<2x128xf32>
    %63 = vector.extract_strided_slice %16 {offsets = [0, 6], sizes = [2, 1], strides = [1, 1]} : vector<2x8xf32> to vector<2x1xf32>
    %64 = vector.shape_cast %63 : vector<2x1xf32> to vector<2x1xf32>
    %65 = vector.broadcast %64 : vector<2x1xf32> to vector<2x128xf32>
    %66 = arith.select %53, %65, %14 : vector<2x128xi1>, vector<2x128xf32>
    %67 = vector.extract_strided_slice %16 {offsets = [0, 7], sizes = [2, 1], strides = [1, 1]} : vector<2x8xf32> to vector<2x1xf32>
    %68 = vector.shape_cast %67 : vector<2x1xf32> to vector<2x1xf32>
    %69 = vector.broadcast %68 : vector<2x1xf32> to vector<2x128xf32>
    %70 = arith.select %53, %69, %14 : vector<2x128xi1>, vector<2x128xf32>
    %71 = vector.extract_strided_slice %11 {offsets = [1, 0, 0], sizes = [1, 2, 8], strides = [1, 1, 1]} : vector<8x2x8xf32> to vector<1x2x8xf32>
    %72 = vector.shape_cast %71 : vector<1x2x8xf32> to vector<2x8xf32>
    %73 = vector.extract_strided_slice %12 {offsets = [1, 0, 0], sizes = [1, 2, 1], strides = [1, 1, 1]} : vector<8x2x1xf32> to vector<1x2x1xf32>
    %74 = vector.shape_cast %73 : vector<1x2x1xf32> to vector<2x1xf32>
    %cst_20 = arith.constant 0.000000e+00 : f32
    %75 = vector.broadcast %cst_20 : f32 to vector<2x1xf32>
    %76 = arith.cmpf ogt, %74, %75 : vector<2x1xf32>
    %77 = vector.extract_strided_slice %72 {offsets = [0, 0], sizes = [2, 1], strides = [1, 1]} : vector<2x8xf32> to vector<2x1xf32>
    %78 = vector.extract_strided_slice %72 {offsets = [0, 1], sizes = [2, 1], strides = [1, 1]} : vector<2x8xf32> to vector<2x1xf32>
    %79 = vector.extract_strided_slice %72 {offsets = [0, 2], sizes = [2, 1], strides = [1, 1]} : vector<2x8xf32> to vector<2x1xf32>
    %80 = vector.extract_strided_slice %72 {offsets = [0, 3], sizes = [2, 1], strides = [1, 1]} : vector<2x8xf32> to vector<2x1xf32>
    %81 = vector.broadcast %77 : vector<2x1xf32> to vector<2x128xf32>
    %82 = arith.maximumf %1, %81 : vector<2x128xf32>
    %83 = vector.broadcast %78 : vector<2x1xf32> to vector<2x128xf32>
    %84 = arith.maximumf %3, %83 : vector<2x128xf32>
    %85 = vector.broadcast %79 : vector<2x1xf32> to vector<2x128xf32>
    %86 = arith.minimumf %5, %85 : vector<2x128xf32>
    %87 = vector.broadcast %80 : vector<2x1xf32> to vector<2x128xf32>
    %88 = arith.minimumf %7, %87 : vector<2x128xf32>
    %89 = arith.subf %86, %82 : vector<2x128xf32>
    %cst_21 = arith.constant 0.000000e+00 : f32
    %90 = vector.broadcast %cst_21 : f32 to vector<2x128xf32>
    %91 = arith.maximumf %89, %90 : vector<2x128xf32>
    %92 = arith.subf %88, %84 : vector<2x128xf32>
    %cst_22 = arith.constant 0.000000e+00 : f32
    %93 = vector.broadcast %cst_22 : f32 to vector<2x128xf32>
    %94 = arith.maximumf %92, %93 : vector<2x128xf32>
    %95 = arith.mulf %91, %94 : vector<2x128xf32>
    %96 = arith.subf %79, %77 : vector<2x1xf32>
    %97 = arith.subf %80, %78 : vector<2x1xf32>
    %98 = arith.mulf %96, %97 : vector<2x1xf32>
    %99 = vector.broadcast %98 : vector<2x1xf32> to vector<2x128xf32>
    %100 = arith.addf %10, %99 : vector<2x128xf32>
    %101 = arith.subf %100, %95 : vector<2x128xf32>
    %cst_23 = arith.constant 9.99999997E-7 : f32
    %102 = vector.broadcast %cst_23 : f32 to vector<2x128xf32>
    %103 = arith.maximumf %101, %102 : vector<2x128xf32>
    %104 = arith.divf %95, %103 : vector<2x128xf32>
    %cst_24 = arith.constant -1.000000e+00 : f32
    %105 = vector.shape_cast %76 : vector<2x1xi1> to vector<2x1xi1>
    %106 = vector.broadcast %105 : vector<2x1xi1> to vector<2x128xi1>
    %107 = vector.broadcast %cst_24 : f32 to vector<2x128xf32>
    %108 = arith.select %106, %104, %107 : vector<2x128xi1>, vector<2x128xf32>
    %109 = arith.cmpf ogt, %108, %54 : vector<2x128xf32>
    %110 = arith.select %109, %108, %54 : vector<2x128xi1>, vector<2x128xf32>
    %111 = vector.extract_strided_slice %72 {offsets = [0, 4], sizes = [2, 1], strides = [1, 1]} : vector<2x8xf32> to vector<2x1xf32>
    %112 = vector.shape_cast %111 : vector<2x1xf32> to vector<2x1xf32>
    %113 = vector.broadcast %112 : vector<2x1xf32> to vector<2x128xf32>
    %114 = arith.select %109, %113, %58 : vector<2x128xi1>, vector<2x128xf32>
    %115 = vector.extract_strided_slice %72 {offsets = [0, 5], sizes = [2, 1], strides = [1, 1]} : vector<2x8xf32> to vector<2x1xf32>
    %116 = vector.shape_cast %115 : vector<2x1xf32> to vector<2x1xf32>
    %117 = vector.broadcast %116 : vector<2x1xf32> to vector<2x128xf32>
    %118 = arith.select %109, %117, %62 : vector<2x128xi1>, vector<2x128xf32>
    %119 = vector.extract_strided_slice %72 {offsets = [0, 6], sizes = [2, 1], strides = [1, 1]} : vector<2x8xf32> to vector<2x1xf32>
    %120 = vector.shape_cast %119 : vector<2x1xf32> to vector<2x1xf32>
    %121 = vector.broadcast %120 : vector<2x1xf32> to vector<2x128xf32>
    %122 = arith.select %109, %121, %66 : vector<2x128xi1>, vector<2x128xf32>
    %123 = vector.extract_strided_slice %72 {offsets = [0, 7], sizes = [2, 1], strides = [1, 1]} : vector<2x8xf32> to vector<2x1xf32>
    %124 = vector.shape_cast %123 : vector<2x1xf32> to vector<2x1xf32>
    %125 = vector.broadcast %124 : vector<2x1xf32> to vector<2x128xf32>
    %126 = arith.select %109, %125, %70 : vector<2x128xi1>, vector<2x128xf32>
    %127 = vector.extract_strided_slice %11 {offsets = [2, 0, 0], sizes = [1, 2, 8], strides = [1, 1, 1]} : vector<8x2x8xf32> to vector<1x2x8xf32>
    %128 = vector.shape_cast %127 : vector<1x2x8xf32> to vector<2x8xf32>
    %129 = vector.extract_strided_slice %12 {offsets = [2, 0, 0], sizes = [1, 2, 1], strides = [1, 1, 1]} : vector<8x2x1xf32> to vector<1x2x1xf32>
    %130 = vector.shape_cast %129 : vector<1x2x1xf32> to vector<2x1xf32>
    %cst_25 = arith.constant 0.000000e+00 : f32
    %131 = vector.broadcast %cst_25 : f32 to vector<2x1xf32>
    %132 = arith.cmpf ogt, %130, %131 : vector<2x1xf32>
    %133 = vector.extract_strided_slice %128 {offsets = [0, 0], sizes = [2, 1], strides = [1, 1]} : vector<2x8xf32> to vector<2x1xf32>
    %134 = vector.extract_strided_slice %128 {offsets = [0, 1], sizes = [2, 1], strides = [1, 1]} : vector<2x8xf32> to vector<2x1xf32>
    %135 = vector.extract_strided_slice %128 {offsets = [0, 2], sizes = [2, 1], strides = [1, 1]} : vector<2x8xf32> to vector<2x1xf32>
    %136 = vector.extract_strided_slice %128 {offsets = [0, 3], sizes = [2, 1], strides = [1, 1]} : vector<2x8xf32> to vector<2x1xf32>
    %137 = vector.broadcast %133 : vector<2x1xf32> to vector<2x128xf32>
    %138 = arith.maximumf %1, %137 : vector<2x128xf32>
    %139 = vector.broadcast %134 : vector<2x1xf32> to vector<2x128xf32>
    %140 = arith.maximumf %3, %139 : vector<2x128xf32>
    %141 = vector.broadcast %135 : vector<2x1xf32> to vector<2x128xf32>
    %142 = arith.minimumf %5, %141 : vector<2x128xf32>
    %143 = vector.broadcast %136 : vector<2x1xf32> to vector<2x128xf32>
    %144 = arith.minimumf %7, %143 : vector<2x128xf32>
    %145 = arith.subf %142, %138 : vector<2x128xf32>
    %cst_26 = arith.constant 0.000000e+00 : f32
    %146 = vector.broadcast %cst_26 : f32 to vector<2x128xf32>
    %147 = arith.maximumf %145, %146 : vector<2x128xf32>
    %148 = arith.subf %144, %140 : vector<2x128xf32>
    %cst_27 = arith.constant 0.000000e+00 : f32
    %149 = vector.broadcast %cst_27 : f32 to vector<2x128xf32>
    %150 = arith.maximumf %148, %149 : vector<2x128xf32>
    %151 = arith.mulf %147, %150 : vector<2x128xf32>
    %152 = arith.subf %135, %133 : vector<2x1xf32>
    %153 = arith.subf %136, %134 : vector<2x1xf32>
    %154 = arith.mulf %152, %153 : vector<2x1xf32>
    %155 = vector.broadcast %154 : vector<2x1xf32> to vector<2x128xf32>
    %156 = arith.addf %10, %155 : vector<2x128xf32>
    %157 = arith.subf %156, %151 : vector<2x128xf32>
    %cst_28 = arith.constant 9.99999997E-7 : f32
    %158 = vector.broadcast %cst_28 : f32 to vector<2x128xf32>
    %159 = arith.maximumf %157, %158 : vector<2x128xf32>
    %160 = arith.divf %151, %159 : vector<2x128xf32>
    %cst_29 = arith.constant -1.000000e+00 : f32
    %161 = vector.shape_cast %132 : vector<2x1xi1> to vector<2x1xi1>
    %162 = vector.broadcast %161 : vector<2x1xi1> to vector<2x128xi1>
    %163 = vector.broadcast %cst_29 : f32 to vector<2x128xf32>
    %164 = arith.select %162, %160, %163 : vector<2x128xi1>, vector<2x128xf32>
    %165 = arith.cmpf ogt, %164, %110 : vector<2x128xf32>
    %166 = arith.select %165, %164, %110 : vector<2x128xi1>, vector<2x128xf32>
    %167 = vector.extract_strided_slice %128 {offsets = [0, 4], sizes = [2, 1], strides = [1, 1]} : vector<2x8xf32> to vector<2x1xf32>
    %168 = vector.shape_cast %167 : vector<2x1xf32> to vector<2x1xf32>
    %169 = vector.broadcast %168 : vector<2x1xf32> to vector<2x128xf32>
    %170 = arith.select %165, %169, %114 : vector<2x128xi1>, vector<2x128xf32>
    %171 = vector.extract_strided_slice %128 {offsets = [0, 5], sizes = [2, 1], strides = [1, 1]} : vector<2x8xf32> to vector<2x1xf32>
    %172 = vector.shape_cast %171 : vector<2x1xf32> to vector<2x1xf32>
    %173 = vector.broadcast %172 : vector<2x1xf32> to vector<2x128xf32>
    %174 = arith.select %165, %173, %118 : vector<2x128xi1>, vector<2x128xf32>
    %175 = vector.extract_strided_slice %128 {offsets = [0, 6], sizes = [2, 1], strides = [1, 1]} : vector<2x8xf32> to vector<2x1xf32>
    %176 = vector.shape_cast %175 : vector<2x1xf32> to vector<2x1xf32>
    %177 = vector.broadcast %176 : vector<2x1xf32> to vector<2x128xf32>
    %178 = arith.select %165, %177, %122 : vector<2x128xi1>, vector<2x128xf32>
    %179 = vector.extract_strided_slice %128 {offsets = [0, 7], sizes = [2, 1], strides = [1, 1]} : vector<2x8xf32> to vector<2x1xf32>
    %180 = vector.shape_cast %179 : vector<2x1xf32> to vector<2x1xf32>
    %181 = vector.broadcast %180 : vector<2x1xf32> to vector<2x128xf32>
    %182 = arith.select %165, %181, %126 : vector<2x128xi1>, vector<2x128xf32>
    %183 = vector.extract_strided_slice %11 {offsets = [3, 0, 0], sizes = [1, 2, 8], strides = [1, 1, 1]} : vector<8x2x8xf32> to vector<1x2x8xf32>
    %184 = vector.shape_cast %183 : vector<1x2x8xf32> to vector<2x8xf32>
    %185 = vector.extract_strided_slice %12 {offsets = [3, 0, 0], sizes = [1, 2, 1], strides = [1, 1, 1]} : vector<8x2x1xf32> to vector<1x2x1xf32>
    %186 = vector.shape_cast %185 : vector<1x2x1xf32> to vector<2x1xf32>
    %cst_30 = arith.constant 0.000000e+00 : f32
    %187 = vector.broadcast %cst_30 : f32 to vector<2x1xf32>
    %188 = arith.cmpf ogt, %186, %187 : vector<2x1xf32>
    %189 = vector.extract_strided_slice %184 {offsets = [0, 0], sizes = [2, 1], strides = [1, 1]} : vector<2x8xf32> to vector<2x1xf32>
    %190 = vector.extract_strided_slice %184 {offsets = [0, 1], sizes = [2, 1], strides = [1, 1]} : vector<2x8xf32> to vector<2x1xf32>
    %191 = vector.extract_strided_slice %184 {offsets = [0, 2], sizes = [2, 1], strides = [1, 1]} : vector<2x8xf32> to vector<2x1xf32>
    %192 = vector.extract_strided_slice %184 {offsets = [0, 3], sizes = [2, 1], strides = [1, 1]} : vector<2x8xf32> to vector<2x1xf32>
    %193 = vector.broadcast %189 : vector<2x1xf32> to vector<2x128xf32>
    %194 = arith.maximumf %1, %193 : vector<2x128xf32>
    %195 = vector.broadcast %190 : vector<2x1xf32> to vector<2x128xf32>
    %196 = arith.maximumf %3, %195 : vector<2x128xf32>
    %197 = vector.broadcast %191 : vector<2x1xf32> to vector<2x128xf32>
    %198 = arith.minimumf %5, %197 : vector<2x128xf32>
    %199 = vector.broadcast %192 : vector<2x1xf32> to vector<2x128xf32>
    %200 = arith.minimumf %7, %199 : vector<2x128xf32>
    %201 = arith.subf %198, %194 : vector<2x128xf32>
    %cst_31 = arith.constant 0.000000e+00 : f32
    %202 = vector.broadcast %cst_31 : f32 to vector<2x128xf32>
    %203 = arith.maximumf %201, %202 : vector<2x128xf32>
    %204 = arith.subf %200, %196 : vector<2x128xf32>
    %cst_32 = arith.constant 0.000000e+00 : f32
    %205 = vector.broadcast %cst_32 : f32 to vector<2x128xf32>
    %206 = arith.maximumf %204, %205 : vector<2x128xf32>
    %207 = arith.mulf %203, %206 : vector<2x128xf32>
    %208 = arith.subf %191, %189 : vector<2x1xf32>
    %209 = arith.subf %192, %190 : vector<2x1xf32>
    %210 = arith.mulf %208, %209 : vector<2x1xf32>
    %211 = vector.broadcast %210 : vector<2x1xf32> to vector<2x128xf32>
    %212 = arith.addf %10, %211 : vector<2x128xf32>
    %213 = arith.subf %212, %207 : vector<2x128xf32>
    %cst_33 = arith.constant 9.99999997E-7 : f32
    %214 = vector.broadcast %cst_33 : f32 to vector<2x128xf32>
    %215 = arith.maximumf %213, %214 : vector<2x128xf32>
    %216 = arith.divf %207, %215 : vector<2x128xf32>
    %cst_34 = arith.constant -1.000000e+00 : f32
    %217 = vector.shape_cast %188 : vector<2x1xi1> to vector<2x1xi1>
    %218 = vector.broadcast %217 : vector<2x1xi1> to vector<2x128xi1>
    %219 = vector.broadcast %cst_34 : f32 to vector<2x128xf32>
    %220 = arith.select %218, %216, %219 : vector<2x128xi1>, vector<2x128xf32>
    %221 = arith.cmpf ogt, %220, %166 : vector<2x128xf32>
    %222 = arith.select %221, %220, %166 : vector<2x128xi1>, vector<2x128xf32>
    %223 = vector.extract_strided_slice %184 {offsets = [0, 4], sizes = [2, 1], strides = [1, 1]} : vector<2x8xf32> to vector<2x1xf32>
    %224 = vector.shape_cast %223 : vector<2x1xf32> to vector<2x1xf32>
    %225 = vector.broadcast %224 : vector<2x1xf32> to vector<2x128xf32>
    %226 = arith.select %221, %225, %170 : vector<2x128xi1>, vector<2x128xf32>
    %227 = vector.extract_strided_slice %184 {offsets = [0, 5], sizes = [2, 1], strides = [1, 1]} : vector<2x8xf32> to vector<2x1xf32>
    %228 = vector.shape_cast %227 : vector<2x1xf32> to vector<2x1xf32>
    %229 = vector.broadcast %228 : vector<2x1xf32> to vector<2x128xf32>
    %230 = arith.select %221, %229, %174 : vector<2x128xi1>, vector<2x128xf32>
    %231 = vector.extract_strided_slice %184 {offsets = [0, 6], sizes = [2, 1], strides = [1, 1]} : vector<2x8xf32> to vector<2x1xf32>
    %232 = vector.shape_cast %231 : vector<2x1xf32> to vector<2x1xf32>
    %233 = vector.broadcast %232 : vector<2x1xf32> to vector<2x128xf32>
    %234 = arith.select %221, %233, %178 : vector<2x128xi1>, vector<2x128xf32>
    %235 = vector.extract_strided_slice %184 {offsets = [0, 7], sizes = [2, 1], strides = [1, 1]} : vector<2x8xf32> to vector<2x1xf32>
    %236 = vector.shape_cast %235 : vector<2x1xf32> to vector<2x1xf32>
    %237 = vector.broadcast %236 : vector<2x1xf32> to vector<2x128xf32>
    %238 = arith.select %221, %237, %182 : vector<2x128xi1>, vector<2x128xf32>
    %239 = vector.extract_strided_slice %11 {offsets = [4, 0, 0], sizes = [1, 2, 8], strides = [1, 1, 1]} : vector<8x2x8xf32> to vector<1x2x8xf32>
    %240 = vector.shape_cast %239 : vector<1x2x8xf32> to vector<2x8xf32>
    %241 = vector.extract_strided_slice %12 {offsets = [4, 0, 0], sizes = [1, 2, 1], strides = [1, 1, 1]} : vector<8x2x1xf32> to vector<1x2x1xf32>
    %242 = vector.shape_cast %241 : vector<1x2x1xf32> to vector<2x1xf32>
    %cst_35 = arith.constant 0.000000e+00 : f32
    %243 = vector.broadcast %cst_35 : f32 to vector<2x1xf32>
    %244 = arith.cmpf ogt, %242, %243 : vector<2x1xf32>
    %245 = vector.extract_strided_slice %240 {offsets = [0, 0], sizes = [2, 1], strides = [1, 1]} : vector<2x8xf32> to vector<2x1xf32>
    %246 = vector.extract_strided_slice %240 {offsets = [0, 1], sizes = [2, 1], strides = [1, 1]} : vector<2x8xf32> to vector<2x1xf32>
    %247 = vector.extract_strided_slice %240 {offsets = [0, 2], sizes = [2, 1], strides = [1, 1]} : vector<2x8xf32> to vector<2x1xf32>
    %248 = vector.extract_strided_slice %240 {offsets = [0, 3], sizes = [2, 1], strides = [1, 1]} : vector<2x8xf32> to vector<2x1xf32>
    %249 = vector.broadcast %245 : vector<2x1xf32> to vector<2x128xf32>
    %250 = arith.maximumf %1, %249 : vector<2x128xf32>
    %251 = vector.broadcast %246 : vector<2x1xf32> to vector<2x128xf32>
    %252 = arith.maximumf %3, %251 : vector<2x128xf32>
    %253 = vector.broadcast %247 : vector<2x1xf32> to vector<2x128xf32>
    %254 = arith.minimumf %5, %253 : vector<2x128xf32>
    %255 = vector.broadcast %248 : vector<2x1xf32> to vector<2x128xf32>
    %256 = arith.minimumf %7, %255 : vector<2x128xf32>
    %257 = arith.subf %254, %250 : vector<2x128xf32>
    %cst_36 = arith.constant 0.000000e+00 : f32
    %258 = vector.broadcast %cst_36 : f32 to vector<2x128xf32>
    %259 = arith.maximumf %257, %258 : vector<2x128xf32>
    %260 = arith.subf %256, %252 : vector<2x128xf32>
    %cst_37 = arith.constant 0.000000e+00 : f32
    %261 = vector.broadcast %cst_37 : f32 to vector<2x128xf32>
    %262 = arith.maximumf %260, %261 : vector<2x128xf32>
    %263 = arith.mulf %259, %262 : vector<2x128xf32>
    %264 = arith.subf %247, %245 : vector<2x1xf32>
    %265 = arith.subf %248, %246 : vector<2x1xf32>
    %266 = arith.mulf %264, %265 : vector<2x1xf32>
    %267 = vector.broadcast %266 : vector<2x1xf32> to vector<2x128xf32>
    %268 = arith.addf %10, %267 : vector<2x128xf32>
    %269 = arith.subf %268, %263 : vector<2x128xf32>
    %cst_38 = arith.constant 9.99999997E-7 : f32
    %270 = vector.broadcast %cst_38 : f32 to vector<2x128xf32>
    %271 = arith.maximumf %269, %270 : vector<2x128xf32>
    %272 = arith.divf %263, %271 : vector<2x128xf32>
    %cst_39 = arith.constant -1.000000e+00 : f32
    %273 = vector.shape_cast %244 : vector<2x1xi1> to vector<2x1xi1>
    %274 = vector.broadcast %273 : vector<2x1xi1> to vector<2x128xi1>
    %275 = vector.broadcast %cst_39 : f32 to vector<2x128xf32>
    %276 = arith.select %274, %272, %275 : vector<2x128xi1>, vector<2x128xf32>
    %277 = arith.cmpf ogt, %276, %222 : vector<2x128xf32>
    %278 = arith.select %277, %276, %222 : vector<2x128xi1>, vector<2x128xf32>
    %279 = vector.extract_strided_slice %240 {offsets = [0, 4], sizes = [2, 1], strides = [1, 1]} : vector<2x8xf32> to vector<2x1xf32>
    %280 = vector.shape_cast %279 : vector<2x1xf32> to vector<2x1xf32>
    %281 = vector.broadcast %280 : vector<2x1xf32> to vector<2x128xf32>
    %282 = arith.select %277, %281, %226 : vector<2x128xi1>, vector<2x128xf32>
    %283 = vector.extract_strided_slice %240 {offsets = [0, 5], sizes = [2, 1], strides = [1, 1]} : vector<2x8xf32> to vector<2x1xf32>
    %284 = vector.shape_cast %283 : vector<2x1xf32> to vector<2x1xf32>
    %285 = vector.broadcast %284 : vector<2x1xf32> to vector<2x128xf32>
    %286 = arith.select %277, %285, %230 : vector<2x128xi1>, vector<2x128xf32>
    %287 = vector.extract_strided_slice %240 {offsets = [0, 6], sizes = [2, 1], strides = [1, 1]} : vector<2x8xf32> to vector<2x1xf32>
    %288 = vector.shape_cast %287 : vector<2x1xf32> to vector<2x1xf32>
    %289 = vector.broadcast %288 : vector<2x1xf32> to vector<2x128xf32>
    %290 = arith.select %277, %289, %234 : vector<2x128xi1>, vector<2x128xf32>
    %291 = vector.extract_strided_slice %240 {offsets = [0, 7], sizes = [2, 1], strides = [1, 1]} : vector<2x8xf32> to vector<2x1xf32>
    %292 = vector.shape_cast %291 : vector<2x1xf32> to vector<2x1xf32>
    %293 = vector.broadcast %292 : vector<2x1xf32> to vector<2x128xf32>
    %294 = arith.select %277, %293, %238 : vector<2x128xi1>, vector<2x128xf32>
    %295 = vector.extract_strided_slice %11 {offsets = [5, 0, 0], sizes = [1, 2, 8], strides = [1, 1, 1]} : vector<8x2x8xf32> to vector<1x2x8xf32>
    %296 = vector.shape_cast %295 : vector<1x2x8xf32> to vector<2x8xf32>
    %297 = vector.extract_strided_slice %12 {offsets = [5, 0, 0], sizes = [1, 2, 1], strides = [1, 1, 1]} : vector<8x2x1xf32> to vector<1x2x1xf32>
    %298 = vector.shape_cast %297 : vector<1x2x1xf32> to vector<2x1xf32>
    %cst_40 = arith.constant 0.000000e+00 : f32
    %299 = vector.broadcast %cst_40 : f32 to vector<2x1xf32>
    %300 = arith.cmpf ogt, %298, %299 : vector<2x1xf32>
    %301 = vector.extract_strided_slice %296 {offsets = [0, 0], sizes = [2, 1], strides = [1, 1]} : vector<2x8xf32> to vector<2x1xf32>
    %302 = vector.extract_strided_slice %296 {offsets = [0, 1], sizes = [2, 1], strides = [1, 1]} : vector<2x8xf32> to vector<2x1xf32>
    %303 = vector.extract_strided_slice %296 {offsets = [0, 2], sizes = [2, 1], strides = [1, 1]} : vector<2x8xf32> to vector<2x1xf32>
    %304 = vector.extract_strided_slice %296 {offsets = [0, 3], sizes = [2, 1], strides = [1, 1]} : vector<2x8xf32> to vector<2x1xf32>
    %305 = vector.broadcast %301 : vector<2x1xf32> to vector<2x128xf32>
    %306 = arith.maximumf %1, %305 : vector<2x128xf32>
    %307 = vector.broadcast %302 : vector<2x1xf32> to vector<2x128xf32>
    %308 = arith.maximumf %3, %307 : vector<2x128xf32>
    %309 = vector.broadcast %303 : vector<2x1xf32> to vector<2x128xf32>
    %310 = arith.minimumf %5, %309 : vector<2x128xf32>
    %311 = vector.broadcast %304 : vector<2x1xf32> to vector<2x128xf32>
    %312 = arith.minimumf %7, %311 : vector<2x128xf32>
    %313 = arith.subf %310, %306 : vector<2x128xf32>
    %cst_41 = arith.constant 0.000000e+00 : f32
    %314 = vector.broadcast %cst_41 : f32 to vector<2x128xf32>
    %315 = arith.maximumf %313, %314 : vector<2x128xf32>
    %316 = arith.subf %312, %308 : vector<2x128xf32>
    %cst_42 = arith.constant 0.000000e+00 : f32
    %317 = vector.broadcast %cst_42 : f32 to vector<2x128xf32>
    %318 = arith.maximumf %316, %317 : vector<2x128xf32>
    %319 = arith.mulf %315, %318 : vector<2x128xf32>
    %320 = arith.subf %303, %301 : vector<2x1xf32>
    %321 = arith.subf %304, %302 : vector<2x1xf32>
    %322 = arith.mulf %320, %321 : vector<2x1xf32>
    %323 = vector.broadcast %322 : vector<2x1xf32> to vector<2x128xf32>
    %324 = arith.addf %10, %323 : vector<2x128xf32>
    %325 = arith.subf %324, %319 : vector<2x128xf32>
    %cst_43 = arith.constant 9.99999997E-7 : f32
    %326 = vector.broadcast %cst_43 : f32 to vector<2x128xf32>
    %327 = arith.maximumf %325, %326 : vector<2x128xf32>
    %328 = arith.divf %319, %327 : vector<2x128xf32>
    %cst_44 = arith.constant -1.000000e+00 : f32
    %329 = vector.shape_cast %300 : vector<2x1xi1> to vector<2x1xi1>
    %330 = vector.broadcast %329 : vector<2x1xi1> to vector<2x128xi1>
    %331 = vector.broadcast %cst_44 : f32 to vector<2x128xf32>
    %332 = arith.select %330, %328, %331 : vector<2x128xi1>, vector<2x128xf32>
    %333 = arith.cmpf ogt, %332, %278 : vector<2x128xf32>
    %334 = arith.select %333, %332, %278 : vector<2x128xi1>, vector<2x128xf32>
    %335 = vector.extract_strided_slice %296 {offsets = [0, 4], sizes = [2, 1], strides = [1, 1]} : vector<2x8xf32> to vector<2x1xf32>
    %336 = vector.shape_cast %335 : vector<2x1xf32> to vector<2x1xf32>
    %337 = vector.broadcast %336 : vector<2x1xf32> to vector<2x128xf32>
    %338 = arith.select %333, %337, %282 : vector<2x128xi1>, vector<2x128xf32>
    %339 = vector.extract_strided_slice %296 {offsets = [0, 5], sizes = [2, 1], strides = [1, 1]} : vector<2x8xf32> to vector<2x1xf32>
    %340 = vector.shape_cast %339 : vector<2x1xf32> to vector<2x1xf32>
    %341 = vector.broadcast %340 : vector<2x1xf32> to vector<2x128xf32>
    %342 = arith.select %333, %341, %286 : vector<2x128xi1>, vector<2x128xf32>
    %343 = vector.extract_strided_slice %296 {offsets = [0, 6], sizes = [2, 1], strides = [1, 1]} : vector<2x8xf32> to vector<2x1xf32>
    %344 = vector.shape_cast %343 : vector<2x1xf32> to vector<2x1xf32>
    %345 = vector.broadcast %344 : vector<2x1xf32> to vector<2x128xf32>
    %346 = arith.select %333, %345, %290 : vector<2x128xi1>, vector<2x128xf32>
    %347 = vector.extract_strided_slice %296 {offsets = [0, 7], sizes = [2, 1], strides = [1, 1]} : vector<2x8xf32> to vector<2x1xf32>
    %348 = vector.shape_cast %347 : vector<2x1xf32> to vector<2x1xf32>
    %349 = vector.broadcast %348 : vector<2x1xf32> to vector<2x128xf32>
    %350 = arith.select %333, %349, %294 : vector<2x128xi1>, vector<2x128xf32>
    %351 = vector.extract_strided_slice %11 {offsets = [6, 0, 0], sizes = [1, 2, 8], strides = [1, 1, 1]} : vector<8x2x8xf32> to vector<1x2x8xf32>
    %352 = vector.shape_cast %351 : vector<1x2x8xf32> to vector<2x8xf32>
    %353 = vector.extract_strided_slice %12 {offsets = [6, 0, 0], sizes = [1, 2, 1], strides = [1, 1, 1]} : vector<8x2x1xf32> to vector<1x2x1xf32>
    %354 = vector.shape_cast %353 : vector<1x2x1xf32> to vector<2x1xf32>
    %cst_45 = arith.constant 0.000000e+00 : f32
    %355 = vector.broadcast %cst_45 : f32 to vector<2x1xf32>
    %356 = arith.cmpf ogt, %354, %355 : vector<2x1xf32>
    %357 = vector.extract_strided_slice %352 {offsets = [0, 0], sizes = [2, 1], strides = [1, 1]} : vector<2x8xf32> to vector<2x1xf32>
    %358 = vector.extract_strided_slice %352 {offsets = [0, 1], sizes = [2, 1], strides = [1, 1]} : vector<2x8xf32> to vector<2x1xf32>
    %359 = vector.extract_strided_slice %352 {offsets = [0, 2], sizes = [2, 1], strides = [1, 1]} : vector<2x8xf32> to vector<2x1xf32>
    %360 = vector.extract_strided_slice %352 {offsets = [0, 3], sizes = [2, 1], strides = [1, 1]} : vector<2x8xf32> to vector<2x1xf32>
    %361 = vector.broadcast %357 : vector<2x1xf32> to vector<2x128xf32>
    %362 = arith.maximumf %1, %361 : vector<2x128xf32>
    %363 = vector.broadcast %358 : vector<2x1xf32> to vector<2x128xf32>
    %364 = arith.maximumf %3, %363 : vector<2x128xf32>
    %365 = vector.broadcast %359 : vector<2x1xf32> to vector<2x128xf32>
    %366 = arith.minimumf %5, %365 : vector<2x128xf32>
    %367 = vector.broadcast %360 : vector<2x1xf32> to vector<2x128xf32>
    %368 = arith.minimumf %7, %367 : vector<2x128xf32>
    %369 = arith.subf %366, %362 : vector<2x128xf32>
    %cst_46 = arith.constant 0.000000e+00 : f32
    %370 = vector.broadcast %cst_46 : f32 to vector<2x128xf32>
    %371 = arith.maximumf %369, %370 : vector<2x128xf32>
    %372 = arith.subf %368, %364 : vector<2x128xf32>
    %cst_47 = arith.constant 0.000000e+00 : f32
    %373 = vector.broadcast %cst_47 : f32 to vector<2x128xf32>
    %374 = arith.maximumf %372, %373 : vector<2x128xf32>
    %375 = arith.mulf %371, %374 : vector<2x128xf32>
    %376 = arith.subf %359, %357 : vector<2x1xf32>
    %377 = arith.subf %360, %358 : vector<2x1xf32>
    %378 = arith.mulf %376, %377 : vector<2x1xf32>
    %379 = vector.broadcast %378 : vector<2x1xf32> to vector<2x128xf32>
    %380 = arith.addf %10, %379 : vector<2x128xf32>
    %381 = arith.subf %380, %375 : vector<2x128xf32>
    %cst_48 = arith.constant 9.99999997E-7 : f32
    %382 = vector.broadcast %cst_48 : f32 to vector<2x128xf32>
    %383 = arith.maximumf %381, %382 : vector<2x128xf32>
    %384 = arith.divf %375, %383 : vector<2x128xf32>
    %cst_49 = arith.constant -1.000000e+00 : f32
    %385 = vector.shape_cast %356 : vector<2x1xi1> to vector<2x1xi1>
    %386 = vector.broadcast %385 : vector<2x1xi1> to vector<2x128xi1>
    %387 = vector.broadcast %cst_49 : f32 to vector<2x128xf32>
    %388 = arith.select %386, %384, %387 : vector<2x128xi1>, vector<2x128xf32>
    %389 = arith.cmpf ogt, %388, %334 : vector<2x128xf32>
    %390 = arith.select %389, %388, %334 : vector<2x128xi1>, vector<2x128xf32>
    %391 = vector.extract_strided_slice %352 {offsets = [0, 4], sizes = [2, 1], strides = [1, 1]} : vector<2x8xf32> to vector<2x1xf32>
    %392 = vector.shape_cast %391 : vector<2x1xf32> to vector<2x1xf32>
    %393 = vector.broadcast %392 : vector<2x1xf32> to vector<2x128xf32>
    %394 = arith.select %389, %393, %338 : vector<2x128xi1>, vector<2x128xf32>
    %395 = vector.extract_strided_slice %352 {offsets = [0, 5], sizes = [2, 1], strides = [1, 1]} : vector<2x8xf32> to vector<2x1xf32>
    %396 = vector.shape_cast %395 : vector<2x1xf32> to vector<2x1xf32>
    %397 = vector.broadcast %396 : vector<2x1xf32> to vector<2x128xf32>
    %398 = arith.select %389, %397, %342 : vector<2x128xi1>, vector<2x128xf32>
    %399 = vector.extract_strided_slice %352 {offsets = [0, 6], sizes = [2, 1], strides = [1, 1]} : vector<2x8xf32> to vector<2x1xf32>
    %400 = vector.shape_cast %399 : vector<2x1xf32> to vector<2x1xf32>
    %401 = vector.broadcast %400 : vector<2x1xf32> to vector<2x128xf32>
    %402 = arith.select %389, %401, %346 : vector<2x128xi1>, vector<2x128xf32>
    %403 = vector.extract_strided_slice %352 {offsets = [0, 7], sizes = [2, 1], strides = [1, 1]} : vector<2x8xf32> to vector<2x1xf32>
    %404 = vector.shape_cast %403 : vector<2x1xf32> to vector<2x1xf32>
    %405 = vector.broadcast %404 : vector<2x1xf32> to vector<2x128xf32>
    %406 = arith.select %389, %405, %350 : vector<2x128xi1>, vector<2x128xf32>
    %407 = vector.extract_strided_slice %11 {offsets = [7, 0, 0], sizes = [1, 2, 8], strides = [1, 1, 1]} : vector<8x2x8xf32> to vector<1x2x8xf32>
    %408 = vector.shape_cast %407 : vector<1x2x8xf32> to vector<2x8xf32>
    %409 = vector.extract_strided_slice %12 {offsets = [7, 0, 0], sizes = [1, 2, 1], strides = [1, 1, 1]} : vector<8x2x1xf32> to vector<1x2x1xf32>
    %410 = vector.shape_cast %409 : vector<1x2x1xf32> to vector<2x1xf32>
    %cst_50 = arith.constant 0.000000e+00 : f32
    %411 = vector.broadcast %cst_50 : f32 to vector<2x1xf32>
    %412 = arith.cmpf ogt, %410, %411 : vector<2x1xf32>
    %413 = vector.extract_strided_slice %408 {offsets = [0, 0], sizes = [2, 1], strides = [1, 1]} : vector<2x8xf32> to vector<2x1xf32>
    %414 = vector.extract_strided_slice %408 {offsets = [0, 1], sizes = [2, 1], strides = [1, 1]} : vector<2x8xf32> to vector<2x1xf32>
    %415 = vector.extract_strided_slice %408 {offsets = [0, 2], sizes = [2, 1], strides = [1, 1]} : vector<2x8xf32> to vector<2x1xf32>
    %416 = vector.extract_strided_slice %408 {offsets = [0, 3], sizes = [2, 1], strides = [1, 1]} : vector<2x8xf32> to vector<2x1xf32>
    %417 = vector.broadcast %413 : vector<2x1xf32> to vector<2x128xf32>
    %418 = arith.maximumf %1, %417 : vector<2x128xf32>
    %419 = vector.broadcast %414 : vector<2x1xf32> to vector<2x128xf32>
    %420 = arith.maximumf %3, %419 : vector<2x128xf32>
    %421 = vector.broadcast %415 : vector<2x1xf32> to vector<2x128xf32>
    %422 = arith.minimumf %5, %421 : vector<2x128xf32>
    %423 = vector.broadcast %416 : vector<2x1xf32> to vector<2x128xf32>
    %424 = arith.minimumf %7, %423 : vector<2x128xf32>
    %425 = arith.subf %422, %418 : vector<2x128xf32>
    %cst_51 = arith.constant 0.000000e+00 : f32
    %426 = vector.broadcast %cst_51 : f32 to vector<2x128xf32>
    %427 = arith.maximumf %425, %426 : vector<2x128xf32>
    %428 = arith.subf %424, %420 : vector<2x128xf32>
    %cst_52 = arith.constant 0.000000e+00 : f32
    %429 = vector.broadcast %cst_52 : f32 to vector<2x128xf32>
    %430 = arith.maximumf %428, %429 : vector<2x128xf32>
    %431 = arith.mulf %427, %430 : vector<2x128xf32>
    %432 = arith.subf %415, %413 : vector<2x1xf32>
    %433 = arith.subf %416, %414 : vector<2x1xf32>
    %434 = arith.mulf %432, %433 : vector<2x1xf32>
    %435 = vector.broadcast %434 : vector<2x1xf32> to vector<2x128xf32>
    %436 = arith.addf %10, %435 : vector<2x128xf32>
    %437 = arith.subf %436, %431 : vector<2x128xf32>
    %cst_53 = arith.constant 9.99999997E-7 : f32
    %438 = vector.broadcast %cst_53 : f32 to vector<2x128xf32>
    %439 = arith.maximumf %437, %438 : vector<2x128xf32>
    %440 = arith.divf %431, %439 : vector<2x128xf32>
    %cst_54 = arith.constant -1.000000e+00 : f32
    %441 = vector.shape_cast %412 : vector<2x1xi1> to vector<2x1xi1>
    %442 = vector.broadcast %441 : vector<2x1xi1> to vector<2x128xi1>
    %443 = vector.broadcast %cst_54 : f32 to vector<2x128xf32>
    %444 = arith.select %442, %440, %443 : vector<2x128xi1>, vector<2x128xf32>
    %445 = arith.cmpf ogt, %444, %390 : vector<2x128xf32>
    %446 = arith.select %445, %444, %390 : vector<2x128xi1>, vector<2x128xf32>
    %447 = vector.extract_strided_slice %408 {offsets = [0, 4], sizes = [2, 1], strides = [1, 1]} : vector<2x8xf32> to vector<2x1xf32>
    %448 = vector.shape_cast %447 : vector<2x1xf32> to vector<2x1xf32>
    %449 = vector.broadcast %448 : vector<2x1xf32> to vector<2x128xf32>
    %450 = arith.select %445, %449, %394 : vector<2x128xi1>, vector<2x128xf32>
    %451 = vector.extract_strided_slice %408 {offsets = [0, 5], sizes = [2, 1], strides = [1, 1]} : vector<2x8xf32> to vector<2x1xf32>
    %452 = vector.shape_cast %451 : vector<2x1xf32> to vector<2x1xf32>
    %453 = vector.broadcast %452 : vector<2x1xf32> to vector<2x128xf32>
    %454 = arith.select %445, %453, %398 : vector<2x128xi1>, vector<2x128xf32>
    %455 = vector.extract_strided_slice %408 {offsets = [0, 6], sizes = [2, 1], strides = [1, 1]} : vector<2x8xf32> to vector<2x1xf32>
    %456 = vector.shape_cast %455 : vector<2x1xf32> to vector<2x1xf32>
    %457 = vector.broadcast %456 : vector<2x1xf32> to vector<2x128xf32>
    %458 = arith.select %445, %457, %402 : vector<2x128xi1>, vector<2x128xf32>
    %459 = vector.extract_strided_slice %408 {offsets = [0, 7], sizes = [2, 1], strides = [1, 1]} : vector<2x8xf32> to vector<2x1xf32>
    %460 = vector.shape_cast %459 : vector<2x1xf32> to vector<2x1xf32>
    %461 = vector.broadcast %460 : vector<2x1xf32> to vector<2x128xf32>
    %462 = arith.select %445, %461, %406 : vector<2x128xi1>, vector<2x128xf32>
    %463 = tpu.iota {dimensions = array<i32: 1>} : vector<2x128xi32>
    %c128_i32 = arith.constant 128 : i32
    %464 = arith.muli %arg0, %c128_i32 : i32
    %465 = vector.broadcast %464 : i32 to vector<2x128xi32>
    %466 = arith.addi %463, %465 : vector<2x128xi32>
    %c128_i32_55 = arith.constant 128 : i32
    %467 = vector.broadcast %c128_i32_55 : i32 to vector<2x128xi32>
    %468 = arith.cmpi slt, %466, %467 : vector<2x128xi32>
    %cst_56 = arith.constant 0.699999988 : f32
    %469 = vector.broadcast %cst_56 : f32 to vector<2x128xf32>
    %470 = arith.cmpf ogt, %446, %469 : vector<2x128xf32>
    %471 = arith.andi %470, %468 : vector<2x128xi1>
    %cst_57 = arith.constant 3.000000e-01 : f32
    %472 = vector.broadcast %cst_57 : f32 to vector<2x128xf32>
    %473 = arith.cmpf olt, %446, %472 : vector<2x128xf32>
    %cst_58 = arith.constant 0.000000e+00 : f32
    %474 = vector.broadcast %cst_58 : f32 to vector<2x128xf32>
    %475 = arith.cmpf oge, %446, %474 : vector<2x128xf32>
    %476 = arith.andi %473, %475 : vector<2x128xi1>
    %477 = arith.andi %476, %468 : vector<2x128xi1>
    %478 = arith.ori %471, %477 : vector<2x128xi1>
    %cst_59 = arith.constant 1.000000e+00 : f32
    %cst_60 = arith.constant 0.000000e+00 : f32
    %479 = vector.broadcast %cst_59 : f32 to vector<2x128xf32>
    %480 = vector.broadcast %cst_60 : f32 to vector<2x128xf32>
    %481 = arith.select %471, %479, %480 : vector<2x128xi1>, vector<2x128xf32>
    %c0_61 = arith.constant 0 : index
    %c0_62 = arith.constant 0 : index
    %482 = vector.load %arg3[%c0_61, %c0_62] : memref<2x128xf32, #tpu.memory_space<vmem>>, vector<2x128xf32>
    %cst_63 = arith.constant 0.000000e+00 : f32
    %483 = vector.broadcast %cst_63 : f32 to vector<2x128xf32>
    %484 = arith.maximumf %482, %483 : vector<2x128xf32>
    %485 = arith.mulf %482, %481 : vector<2x128xf32>
    %486 = arith.subf %484, %485 : vector<2x128xf32>
    %487 = math.absf %482 : vector<2x128xf32>
    %cst_64 = arith.constant 0.000000e+00 : f32
    %488 = vector.broadcast %cst_64 : f32 to vector<2x128xf32>
    %489 = arith.subf %488, %487 : vector<2x128xf32>
    %490 = math.exp %489 : vector<2x128xf32>
    %cst_65 = arith.constant 1.000000e+00 : f32
    %491 = vector.broadcast %cst_65 : f32 to vector<2x128xf32>
    %492 = arith.addf %491, %490 : vector<2x128xf32>
    %493 = math.log %492 : vector<2x128xf32>
    %494 = arith.addf %486, %493 : vector<2x128xf32>
    %cst_66 = arith.constant 9.99999997E-7 : f32
    %495 = vector.broadcast %cst_66 : f32 to vector<2x128xf32>
    %496 = arith.maximumf %8, %495 : vector<2x128xf32>
    %cst_67 = arith.constant 9.99999997E-7 : f32
    %497 = vector.broadcast %cst_67 : f32 to vector<2x128xf32>
    %498 = arith.maximumf %9, %497 : vector<2x128xf32>
    %cst_68 = arith.constant 5.000000e-01 : f32
    %499 = vector.broadcast %cst_68 : f32 to vector<2x128xf32>
    %500 = arith.mulf %499, %8 : vector<2x128xf32>
    %501 = arith.addf %1, %500 : vector<2x128xf32>
    %cst_69 = arith.constant 5.000000e-01 : f32
    %502 = vector.broadcast %cst_69 : f32 to vector<2x128xf32>
    %503 = arith.mulf %502, %9 : vector<2x128xf32>
    %504 = arith.addf %3, %503 : vector<2x128xf32>
    %505 = arith.subf %450, %501 : vector<2x128xf32>
    %506 = arith.divf %505, %496 : vector<2x128xf32>
    %507 = arith.subf %454, %504 : vector<2x128xf32>
    %508 = arith.divf %507, %498 : vector<2x128xf32>
    %509 = math.log %496 : vector<2x128xf32>
    %510 = arith.subf %458, %509 : vector<2x128xf32>
    %511 = math.log %498 : vector<2x128xf32>
    %512 = arith.subf %462, %511 : vector<2x128xf32>
    %c0_70 = arith.constant 0 : index
    %c0_71 = arith.constant 0 : index
    %c0_72 = arith.constant 0 : index
    %513 = vector.load %arg2[%c0_70, %c0_71, %c0_72] : memref<4x2x128xf32, #tpu.memory_space<vmem>>, vector<1x2x128xf32>
    %514 = vector.shape_cast %513 : vector<1x2x128xf32> to vector<2x128xf32>
    %515 = arith.subf %514, %506 : vector<2x128xf32>
    %516 = math.absf %515 : vector<2x128xf32>
    %cst_73 = arith.constant 1.000000e+00 : f32
    %517 = vector.broadcast %cst_73 : f32 to vector<2x128xf32>
    %518 = arith.cmpf olt, %516, %517 : vector<2x128xf32>
    %cst_74 = arith.constant 5.000000e-01 : f32
    %519 = vector.broadcast %cst_74 : f32 to vector<2x128xf32>
    %520 = arith.mulf %519, %515 : vector<2x128xf32>
    %521 = arith.mulf %520, %515 : vector<2x128xf32>
    %cst_75 = arith.constant 5.000000e-01 : f32
    %522 = vector.broadcast %cst_75 : f32 to vector<2x128xf32>
    %523 = arith.subf %516, %522 : vector<2x128xf32>
    %524 = arith.select %518, %521, %523 : vector<2x128xi1>, vector<2x128xf32>
    %c1_76 = arith.constant 1 : index
    %c0_77 = arith.constant 0 : index
    %c0_78 = arith.constant 0 : index
    %525 = vector.load %arg2[%c1_76, %c0_77, %c0_78] : memref<4x2x128xf32, #tpu.memory_space<vmem>>, vector<1x2x128xf32>
    %526 = vector.shape_cast %525 : vector<1x2x128xf32> to vector<2x128xf32>
    %527 = arith.subf %526, %508 : vector<2x128xf32>
    %528 = math.absf %527 : vector<2x128xf32>
    %cst_79 = arith.constant 1.000000e+00 : f32
    %529 = vector.broadcast %cst_79 : f32 to vector<2x128xf32>
    %530 = arith.cmpf olt, %528, %529 : vector<2x128xf32>
    %cst_80 = arith.constant 5.000000e-01 : f32
    %531 = vector.broadcast %cst_80 : f32 to vector<2x128xf32>
    %532 = arith.mulf %531, %527 : vector<2x128xf32>
    %533 = arith.mulf %532, %527 : vector<2x128xf32>
    %cst_81 = arith.constant 5.000000e-01 : f32
    %534 = vector.broadcast %cst_81 : f32 to vector<2x128xf32>
    %535 = arith.subf %528, %534 : vector<2x128xf32>
    %536 = arith.select %530, %533, %535 : vector<2x128xi1>, vector<2x128xf32>
    %537 = arith.addf %524, %536 : vector<2x128xf32>
    %c2_82 = arith.constant 2 : index
    %c0_83 = arith.constant 0 : index
    %c0_84 = arith.constant 0 : index
    %538 = vector.load %arg2[%c2_82, %c0_83, %c0_84] : memref<4x2x128xf32, #tpu.memory_space<vmem>>, vector<1x2x128xf32>
    %539 = vector.shape_cast %538 : vector<1x2x128xf32> to vector<2x128xf32>
    %540 = arith.subf %539, %510 : vector<2x128xf32>
    %541 = math.absf %540 : vector<2x128xf32>
    %cst_85 = arith.constant 1.000000e+00 : f32
    %542 = vector.broadcast %cst_85 : f32 to vector<2x128xf32>
    %543 = arith.cmpf olt, %541, %542 : vector<2x128xf32>
    %cst_86 = arith.constant 5.000000e-01 : f32
    %544 = vector.broadcast %cst_86 : f32 to vector<2x128xf32>
    %545 = arith.mulf %544, %540 : vector<2x128xf32>
    %546 = arith.mulf %545, %540 : vector<2x128xf32>
    %cst_87 = arith.constant 5.000000e-01 : f32
    %547 = vector.broadcast %cst_87 : f32 to vector<2x128xf32>
    %548 = arith.subf %541, %547 : vector<2x128xf32>
    %549 = arith.select %543, %546, %548 : vector<2x128xi1>, vector<2x128xf32>
    %550 = arith.addf %537, %549 : vector<2x128xf32>
    %c3_88 = arith.constant 3 : index
    %c0_89 = arith.constant 0 : index
    %c0_90 = arith.constant 0 : index
    %551 = vector.load %arg2[%c3_88, %c0_89, %c0_90] : memref<4x2x128xf32, #tpu.memory_space<vmem>>, vector<1x2x128xf32>
    %552 = vector.shape_cast %551 : vector<1x2x128xf32> to vector<2x128xf32>
    %553 = arith.subf %552, %512 : vector<2x128xf32>
    %554 = math.absf %553 : vector<2x128xf32>
    %cst_91 = arith.constant 1.000000e+00 : f32
    %555 = vector.broadcast %cst_91 : f32 to vector<2x128xf32>
    %556 = arith.cmpf olt, %554, %555 : vector<2x128xf32>
    %cst_92 = arith.constant 5.000000e-01 : f32
    %557 = vector.broadcast %cst_92 : f32 to vector<2x128xf32>
    %558 = arith.mulf %557, %553 : vector<2x128xf32>
    %559 = arith.mulf %558, %553 : vector<2x128xf32>
    %cst_93 = arith.constant 5.000000e-01 : f32
    %560 = vector.broadcast %cst_93 : f32 to vector<2x128xf32>
    %561 = arith.subf %554, %560 : vector<2x128xf32>
    %562 = arith.select %556, %559, %561 : vector<2x128xi1>, vector<2x128xf32>
    %563 = arith.addf %550, %562 : vector<2x128xf32>
    %564 = arith.extui %471 : vector<2x128xi1> to vector<2x128xi32>
    %565 = arith.sitofp %564 : vector<2x128xi32> to vector<2x128xf32>
    %cst_94 = arith.constant 0.000000e+00 : f32
    %566 = vector.broadcast %cst_94 : f32 to vector<2x128xf32>
    %567 = arith.select %478, %494, %566 : vector<2x128xi1>, vector<2x128xf32>
    %cst_95 = arith.constant dense<0.000000e+00> : vector<128xf32>
    %568 = vector.multi_reduction <add>, %567, %cst_95 [0] : vector<2x128xf32> to vector<128xf32>
    %569 = vector.shape_cast %568 : vector<128xf32> to vector<1x128xf32>
    %570 = arith.extui %478 : vector<2x128xi1> to vector<2x128xi32>
    %571 = arith.sitofp %570 : vector<2x128xi32> to vector<2x128xf32>
    %cst_96 = arith.constant dense<0.000000e+00> : vector<128xf32>
    %572 = vector.multi_reduction <add>, %571, %cst_96 [0] : vector<2x128xf32> to vector<128xf32>
    %573 = vector.shape_cast %572 : vector<128xf32> to vector<1x128xf32>
    %574 = arith.mulf %563, %565 : vector<2x128xf32>
    %cst_97 = arith.constant dense<0.000000e+00> : vector<128xf32>
    %575 = vector.multi_reduction <add>, %574, %cst_97 [0] : vector<2x128xf32> to vector<128xf32>
    %576 = vector.shape_cast %575 : vector<128xf32> to vector<1x128xf32>
    %cst_98 = arith.constant dense<0.000000e+00> : vector<128xf32>
    %577 = vector.multi_reduction <add>, %565, %cst_98 [0] : vector<2x128xf32> to vector<128xf32>
    %578 = vector.shape_cast %577 : vector<128xf32> to vector<1x128xf32>
    %579 = tpu.concatenate %569, %573, %576, %578 in 0 : vector<1x128xf32>, vector<1x128xf32>, vector<1x128xf32>, vector<1x128xf32> -> vector<4x128xf32>
    %c0_99 = arith.constant 0 : index
    %c0_100 = arith.constant 0 : index
    %580 = vector.load %arg6[%c0_99, %c0_100] : memref<4x128xf32, #tpu.memory_space<vmem>>, vector<4x128xf32>
    tpu.vector_store %arg6[%c0_99, %c0_100], %579 {strides = array<i32>} : memref<4x128xf32, #tpu.memory_space<vmem>>, vector<4x128xf32>,
    return
  }
  func.func @transform_0(%arg0: i32) -> (i32, i32, i32) {
    %c0_i32 = arith.constant 0 : i32
    %c0_i32_0 = arith.constant 0 : i32
    %c0_i32_1 = arith.constant 0 : i32
    return %c0_i32, %c0_i32_0, %arg0 : i32, i32, i32
  }
  func.func @transform_1(%arg0: i32) -> (i32, i32, i32) {
    %c0_i32 = arith.constant 0 : i32
    %c0_i32_0 = arith.constant 0 : i32
    %c0_i32_1 = arith.constant 0 : i32
    return %c0_i32, %c0_i32_0, %arg0 : i32, i32, i32
  }
  func.func @transform_2(%arg0: i32) -> (i32, i32) {
    %c0_i32 = arith.constant 0 : i32
    %c0_i32_0 = arith.constant 0 : i32
    return %c0_i32, %arg0 : i32, i32
  }
  func.func @transform_3(%arg0: i32) -> (i32, i32, i32) {
    %c0_i32 = arith.constant 0 : i32
    %c0_i32_0 = arith.constant 0 : i32
    %c0_i32_1 = arith.constant 0 : i32
    %c0_i32_2 = arith.constant 0 : i32
    return %c0_i32, %c0_i32_0, %c0_i32_1 : i32, i32, i32
  }
  func.func @transform_4(%arg0: i32) -> (i32, i32, i32) {
    %c0_i32 = arith.constant 0 : i32
    %c0_i32_0 = arith.constant 0 : i32
    %c0_i32_1 = arith.constant 0 : i32
    %c0_i32_2 = arith.constant 0 : i32
    return %c0_i32, %c0_i32_0, %c0_i32_1 : i32, i32, i32
  }
  func.func @transform_5(%arg0: i32) -> (i32, i32) {
    %c0_i32 = arith.constant 0 : i32
    %c0_i32_0 = arith.constant 0 : i32
    return %c0_i32, %arg0 : i32, i32
  }
}

</mosaic_0001>

<bundles_post_ra>
// kernel: tpu_custom_call.1
= control target key start
LH: loop header
LB: loop body
LE: loop exit
PB: predicated region body
PF: predicated region fallthrough
CT: control target
= control target key end

     0   :  { %10 = vsyncpa [#allocation3], 0  ;;  %s1941_s0 = inlined_call_operand.hbm [shape: f32[4,2,128], index: 0, kind: input, shape index: {}]   ;;  %s1942_s1 = inlined_call_operand.hbm [shape: f32[4,2,128], index: 1, kind: input, shape index: {}]   ;;  %s1943_s2 = inlined_call_operand.vmem [shape: f32[2,128], index: 2, kind: input, shape index: {}]   ;;  %s1944_s3 = inlined_call_operand.vmem [shape: f32[8,2,8], index: 3, kind: input, shape index: {}]   ;;  %s1945_s4 = inlined_call_operand.vmem [shape: f32[8,2,1], index: 4, kind: input, shape index: {}]   ;;  %s1946_s5 = inlined_call_operand.hbm [shape: f32[4,128], index: 5, kind: output, shape index: {}]  }
   0x1   :  { %11 = vsyncpa [#allocation6], 0 }
   0x2   :  { %12 = vsyncpa [#allocation4], 0  ;;  %s17_s20 = sshll.u32 %s1941_s0, 4  ;;  %s1132_s21 = smov [#allocation2]   ;;  %s18_s20 = int_to_ptr.hbm [resolvable:$true] %s17_s20 }
   0x3   :  { %s19_s22 = sshll.u32 %s1132_s21, 4  ;;  %s30_s25 = sshll.u32 %s1942_s1, 4  ;;  %s20_s22 = int_to_ptr.vmem [resolvable:$true] %s19_s22  ;;  %s31_s25 = int_to_ptr.hbm [resolvable:$true] %s30_s25 }
   0x4   :  { %s1133_s26 = smov 32   ;;  %s1134_s27 = smov 2  }
   0x5   :  { %25 = dma.hbm_to_vmem [thread:$0]  %s18_s20, 128, %s20_s22, [#allocation3], %s1133_s26, %s1133_s26, %s1134_s27  }
   0x6   :  { %s1135_s28 = smov [#allocation5]  }
   0x7   :  { %s32_s29 = sshll.u32 %s1135_s28, 4  ;;  %s33_s29 = int_to_ptr.vmem [resolvable:$true] %s32_s29 }
   0x8   :  { %38 = dma.hbm_to_vmem [thread:$0]  %s31_s25, 128, %s33_s29, [#allocation6], %s1133_s26, %s1133_s26, %s1134_s27  }
   0x9   :  { %1126 = dma.done.wait [#allocation3], 128  }
   0xa   :  { %1127 = vsyncadd [#allocation3], 4294967168 }
   0xb   :  { %1128 = dma.done.wait [#allocation6], 128  }
   0xc   :  { %1129 = vsyncadd [#allocation6], 4294967168  ;;  %v1136_v0 = vmov 2   ;;  %v1137_v1 = vmov 3   ;;  %v1138_v2 = vmov 0   ;;  %v1139_v8 = vmov 1  }
   0xd   :  { %963 = vset.pattern.permute.xlu1 %v1136_v0  ;;  %986 = vset.pattern.permute.xlu0 %v1137_v1  ;;  %v1191_v3 = vld [vmem:[%s1944_s3 + $0x4] sm:$0x3]  ;;  %v1196_v4 = vld [vmem:[%s1944_s3] sm:$0x3]  ;;  %v1209_v6 = vld [vmem:[%s1944_s3 + $0x6] sm:$0x3] }
   0xe   :  { %966 = vset.pattern.permute.xlu2 %v1138_v2  ;;  %280 = vrot.lane.b32.xlu0 %v1191_v3, %s1134_s27  ;;  %v71_v5 = vld [vmem:[%s1945_s4] sm:$0x3]  ;;  %v1948_v9 = vmov 6   ;;  %v1950_v10 = vmov 5   ;;  %v1224_v11 = vld [vmem:[%s1944_s3 + $0x2] sm:$0x3] }
   0xf   :  { %106 = vrot.lane.b32.xlu2 %v1196_v4, %s1134_s27  ;;  %92 = vperm.xlu1 %963, %v1196_v4   ;;  %vm79_vm0 = vcmp.gt.f32.partialorder %v71_v5, 0.0  ;;  %v1947_v12 = vmov 7   ;;  %v1234_v13 = vld [vmem:[%s1944_s3 + $0x8] sm:$0x3]  ;;  %v1143_v14 = vmov 4   ;;  %s1144_s21 = smov 127  }
  0x10   :  { %v138_v7 = vsel %vm79_vm0, 1, %v1138_v2  ;;  %v72_v15 = vld [vmem:[%s1945_s4 + $0x2] sm:$0x3]  ;;  %v73_v17 = vld [vmem:[%s1945_s4 + $0x4] sm:$0x3]  ;;  %s931_s12 = sshll.u32 %s1946_s5, 4  ;;  %s932_s12 = int_to_ptr.hbm [resolvable:$true] %s931_s12 }
  0x11   :  { %vm166_vm1 = vcmp.gt.f32.partialorder %v72_v15, 0.0  ;;  %vm253_vm2 = vcmp.gt.f32.partialorder %v73_v17, 0.0  ;;  %v74_v20 = vld [vmem:[%s1945_s4 + $0x6] sm:$0x3]  ;;  %v1307_v33 = vld [vmem:[#allocation2 + $0x2] sm:$0x3] }
  0x12   :  { %v225_v16 = vsel %vm166_vm1, 1, %v1138_v2  ;;  %v312_v18 = vsel %vm253_vm2, 1, %v1138_v2  ;;  %vm340_vm3 = vcmp.gt.f32.partialorder %v74_v20, 0.0  ;;  %v1305_v32 = vld [vmem:[#allocation2 + $0x6] sm:$0x3] }
  0x13   :  { %v399_v22 = vsel %vm340_vm3, 1, %v1138_v2  ;;  %v1325_v46 = vld [vmem:[#allocation2] sm:$0x3]  ;;  %v1332_v49 = vld [vmem:[#allocation2 + $0x4] sm:$0x3] }
  0x14   :  { %v75_v55 = vld [vmem:[%s1945_s4 + $0x8] sm:$0x3] }
  0x15   :  { %vm427_vm4 = vcmp.gt.f32.partialorder %v75_v55, 0.0 }
  0x16   :  { %358 = vperm.xlu0 %986, %v1209_v6   ;;  %v486_v15 = vsel %vm427_vm4, 1, %v1138_v2 }
  0x17   :  { %140 = vperm.xlu2 %966, %v138_v7   ;;  %964 = vset.pattern.permute.xlu1 %v1137_v1 }
  0x18   :  { %97 = vperm.xlu1 %964, %v1196_v4  }
  0x1e   :  { %987 = vset.pattern.permute.xlu0 %v1139_v8 }
  0x1f   :  { %967 = vset.pattern.permute.xlu2 %v1948_v9  ;;  %87 = vperm.xlu0 %987, %v1196_v4  }
  0x20   :  { %157 = vperm.xlu2 %967, %v1196_v4   ;;  %965 = vset.pattern.permute.xlu1 %v1950_v10 }
  0x21   :  { %152 = vperm.xlu1 %965, %v1196_v4  }
  0x27   :  { %174 = vperm.xlu0 %987, %v1224_v11  }
  0x28   :  { %969 = vset.pattern.permute.xlu2 %v1138_v2 }
  0x29   :  { %169 = vperm.xlu2 %969, %v1224_v11   ;;  %968 = vset.pattern.permute.xlu1 %v1947_v12 }
  0x2a   :  { %162 = vperm.xlu1 %968, %v1196_v4  }
  0x2f   :  { %435 = vperm.xlu0 %987, %v1234_v13  }
  0x31   :  { %971 = vset.pattern.permute.xlu2 %v1137_v1 }
  0x32   :  { %184 = vperm.xlu2 %971, %v1224_v11   ;;  %970 = vset.pattern.permute.xlu1 %v1136_v0 }
  0x33   :  { %179 = vperm.xlu1 %970, %v1224_v11  }
  0x37   :  { %993 = vset.pattern.permute.xlu0 %v1138_v2 }
  0x38   :  { %82 = vperm.xlu0 %993, %v1196_v4  }
  0x3a   :  { %973 = vset.pattern.permute.xlu2 %v1143_v14 }
  0x3b   :  { %234 = vperm.xlu2 %973, %v1224_v11   ;;  %193 = vrot.lane.b32.xlu1 %v1224_v11, %s1134_s27 }
  0x3c   :  { %972 = vset.pattern.permute.xlu1 %v1138_v2 }
  0x40   :  { %314 = vperm.xlu0 %993, %v312_v18  }
  0x43   :  { %975 = vset.pattern.permute.xlu2 %v1948_v9  ;;  %227 = vperm.xlu1 %972, %v225_v16  }
  0x44   :  { %244 = vperm.xlu2 %975, %v1224_v11  }
  0x48   :  { %343 = vperm.xlu0 %993, %v1209_v6  }
  0x4b   :  { %974 = vset.pattern.permute.xlu1 %v1950_v10 }
  0x4c   :  { %977 = vset.pattern.permute.xlu2 %v1139_v8  ;;  %239 = vperm.xlu1 %974, %v1224_v11  }
  0x4d   :  { %261 = vperm.xlu2 %977, %v1191_v3  }
  0x54   :  { %976 = vset.pattern.permute.xlu1 %v1138_v2 }
  0x55   :  { %979 = vset.pattern.permute.xlu2 %v1137_v1  ;;  %256 = vperm.xlu1 %976, %v1191_v3  }
  0x56   :  { %271 = vperm.xlu2 %979, %v1191_v3  }
  0x5d   :  { %978 = vset.pattern.permute.xlu1 %v1136_v0 }
  0x5e   :  { %981 = vset.pattern.permute.xlu2 %v1950_v10  ;;  %266 = vperm.xlu1 %978, %v1191_v3  }
  0x5f   :  { %326 = vperm.xlu2 %981, %v1191_v3  }
  0x66   :  { %980 = vset.pattern.permute.xlu1 %v1143_v14 }
  0x67   :  { %983 = vset.pattern.permute.xlu2 %v1947_v12  ;;  %321 = vperm.xlu1 %980, %v1191_v3  }
  0x68   :  { %336 = vperm.xlu2 %983, %v1191_v3  }
  0x69   :  { %v107_v19 = vpop.permute.xlu2 %106 }
  0x6a   :  { %v1291_v24 = vsub.f32 %v1196_v4, %v107_v19 }
  0x6f   :  { %982 = vset.pattern.permute.xlu1 %v1948_v9 }
  0x70   :  { %985 = vset.pattern.permute.xlu2 %v1136_v0  ;;  %331 = vperm.xlu1 %982, %v1191_v3  }
  0x71   :  { %353 = vperm.xlu2 %985, %v1209_v6   ;;  %v1282_v21 = vpop.permute.xlu2 %140 }
  0x78   :  { %984 = vset.pattern.permute.xlu1 %v1139_v8 }
  0x79   :  { %988 = vset.pattern.permute.xlu2 %v1138_v2  ;;  %348 = vperm.xlu1 %984, %v1209_v6  }
  0x7a   :  { %401 = vperm.xlu2 %988, %v399_v22   ;;  %v1288_v23 = vpop.permute.xlu2 %157 }
  0x80   :  { %v281_v25 = vpop.permute.xlu0 %280 }
  0x81   :  { %367 = vrot.lane.b32.xlu1 %v1209_v6, %s1134_s27  ;;  %v93_v26 = vpop.permute.xlu1 %92  ;;  %v1303_v31 = vsub.f32 %v1191_v3, %v281_v25  ;;  %v1364_v25 = vld [vmem:[%s1944_s3 + $0xa] sm:$0x3] }
  0x82   :  { %111 = vrot.lane.b32.xlu2 %v1291_v24, %s1144_s21  ;;  %989 = vset.pattern.permute.xlu1 %v1950_v10  ;;  %v95_v58 = vmin.f32 %v1332_v49, %v93_v26  ;;  %v1369_v26 = vld [vmem:[%s1944_s3 + $0xe] sm:$0x3] }
  0x83   :  { %v170_v27 = vpop.permute.xlu2 %169  ;;  %990 = vset.pattern.permute.xlu2 %v1948_v9  ;;  %715 = vrot.lane.b32.xlu0 %v1369_v26, %s1134_s27 }
  0x84   :  { %v172_v48 = vmax.f32 %v1325_v46, %v170_v27 }
  0x88   :  { %v1299_v28 = vpop.permute.xlu0 %358 }
  0x89   :  { %413 = vperm.xlu1 %989, %v1209_v6   ;;  %v361_v55 = vmin.f32 %v1305_v32, %v1299_v28 }
  0x8a   :  { %v98_v29 = vpop.permute.xlu1 %97 }
  0x8b   :  { %v100_v35 = vmin.f32 %v1305_v32, %v98_v29 }
  0x8c   :  { %v185_v30 = vpop.permute.xlu2 %184 }
  0x8d   :  { %v187_v40 = vmin.f32 %v1305_v32, %v185_v30 }
  0x91   :  { %285 = vrot.lane.b32.xlu1 %v1303_v31, %s1144_s21  ;;  %v88_v34 = vpop.permute.xlu0 %87 }
  0x92   :  { %v90_v36 = vmax.f32 %v1307_v33, %v88_v34  ;;  %991 = vset.pattern.permute.xlu1 %v1947_v12 }
  0x93   :  { %v1314_v37 = vpop.permute.xlu1 %152 }
  0x94   :  { %v103_v38 = vsub.f32 %v100_v35, %v90_v36 }
  0x95   :  { %v1316_v39 = vpop.permute.xlu2 %234 }
  0x96   :  { %v104_v5 = vmax.f32 %v103_v38, 0.0 }
  0x99   :  { %423 = vperm.xlu1 %991, %v1209_v6   ;;  %v175_v41 = vpop.permute.xlu0 %174 }
  0x9a   :  { %v177_v42 = vmax.f32 %v1307_v33, %v175_v41 }
  0x9c   :  { %v190_v43 = vsub.f32 %v187_v40, %v177_v42  ;;  %v1321_v44 = vpop.permute.xlu1 %162 }
  0x9e   :  { %v1323_v45 = vpop.permute.xlu2 %244  ;;  %v191_v53 = vmax.f32 %v190_v43, 0.0 }
  0xa1   :  { %994 = vset.pattern.permute.xlu1 %v1136_v0  ;;  %v1328_v47 = vpop.permute.xlu0 %435 }
  0xa2   :  { %440 = vperm.xlu1 %994, %v1234_v13  }
  0xa5   :  { %v180_v50 = vpop.permute.xlu1 %179 }
  0xa6   :  { %v182_v51 = vmin.f32 %v1332_v49, %v180_v50 }
  0xa7   :  { %v262_v52 = vpop.permute.xlu2 %261 }
  0xa8   :  { %v188_v54 = vsub.f32 %v182_v51, %v172_v48  ;;  %v264_v63 = vmax.f32 %v1307_v33, %v262_v52 }
  0xaa   :  { %v189_v56 = vmax.f32 %v188_v54, 0.0  ;;  %454 = vrot.lane.b32.xlu1 %v1234_v13, %s1134_s27  ;;  %v83_v57 = vpop.permute.xlu0 %82 }
  0xab   :  { %v85_v59 = vmax.f32 %v1325_v46, %v83_v57  ;;  %996 = vset.pattern.permute.xlu1 %v1138_v2 }
  0xac   :  { %v1343_v60 = vmul.f32 %v191_v53, %v189_v56 }
  0xad   :  { %v101_v61 = vsub.f32 %v95_v58, %v85_v59  ;;  %v194_v62 = vpop.permute.xlu1 %193 }
  0xae   :  { %v1347_v3 = vsub.f32 %v1224_v11, %v194_v62 }
  0xaf   :  { %v102_v7 = vmax.f32 %v101_v61, 0.0 }
  0xb0   :  { %v272_v16 = vpop.permute.xlu2 %271  ;;  %198 = vrot.lane.b32.xlu2 %v1347_v3, %s1144_s21 }
  0xb1   :  { %v274_v17 = vmin.f32 %v1305_v32, %v272_v16  ;;  %v1353_v18 = vmul.f32 %v104_v5, %v102_v7 }
  0xb2   :  { %488 = vperm.xlu1 %996, %v486_v15   ;;  %v1387_v43 = vpop.permute.xlu0 %314 }
  0xb3   :  { %v277_v19 = vsub.f32 %v274_v17, %v264_v63  ;;  %vm316_vm11 = vcmp.eq.s32.totalorder %v1387_v43, 1 }
  0xb5   :  { %v1355_v20 = vpop.permute.xlu1 %227  ;;  %v278_v36 = vmax.f32 %v277_v19, 0.0 }
  0xb6   :  { %vm229_vm0 = vcmp.eq.s32.totalorder %v1355_v20, 1 }
  0xb9   :  { %v1378_v30 = vpop.permute.xlu2 %326 }
  0xba   :  { %998 = vset.pattern.permute.xlu1 %v1950_v10  ;;  %v344_v51 = vpop.permute.xlu0 %343 }
  0xbb   :  { %500 = vperm.xlu1 %998, %v1234_v13   ;;  %v346_v54 = vmax.f32 %v1325_v46, %v344_v51 }
  0xbe   :  { %v1359_v22 = vpop.permute.xlu1 %239 }
  0xc2   :  { %v1389_v48 = vpop.permute.xlu2 %336 }
  0xc3   :  { %1000 = vset.pattern.permute.xlu1 %v1138_v2 }
  0xc4   :  { %517 = vperm.xlu1 %1000, %v1364_v25  }
  0xc7   :  { %v257_v27 = vpop.permute.xlu1 %256 }
  0xc8   :  { %v259_v34 = vmax.f32 %v1325_v46, %v257_v27 }
  0xcb   :  { %v354_v52 = vpop.permute.xlu2 %353 }
  0xcc   :  { %541 = vrot.lane.b32.xlu1 %v1364_v25, %s1134_s27  ;;  %v356_v53 = vmin.f32 %v1332_v49, %v354_v52 }
  0xcd   :  { %1002 = vset.pattern.permute.xlu1 %v1136_v0 }
  0xce   :  { %v362_v56 = vsub.f32 %v356_v53, %v346_v54  ;;  %v76_v54 = vld [vmem:[%s1945_s4 + $0xa] sm:$0x3] }
  0xcf   :  { %vm514_vm5 = vcmp.gt.f32.partialorder %v76_v54, 0.0 }
  0xd0   :  { %v267_v29 = vpop.permute.xlu1 %266  ;;  %v363_v59 = vmax.f32 %v362_v56, 0.0 }
  0xd1   :  { %v269_v35 = vmin.f32 %v1332_v49, %v267_v29 }
  0xd3   :  { %v275_v38 = vsub.f32 %v269_v35, %v259_v34 }
  0xd4   :  { %527 = vperm.xlu1 %1002, %v1364_v25   ;;  %v1427_v35 = vpop.permute.xlu2 %401 }
  0xd5   :  { %v276_v40 = vmax.f32 %v275_v38, 0.0 }
  0xd7   :  { %v1383_v41 = vmul.f32 %v278_v36, %v276_v40  ;;  %v1436_v40 = vld [vmem:[%s1944_s3 + $0xc] sm:$0x3] }
  0xd9   :  { %v1385_v42 = vpop.permute.xlu1 %321 }
  0xdc   :  { %1005 = vset.pattern.permute.xlu1 %v1950_v10  ;;  %v1441_v52 = vpop.permute.xlu2 %111 }
  0xe2   :  { %v1392_v50 = vpop.permute.xlu1 %331 }
  0xeb   :  { %v349_v57 = vpop.permute.xlu1 %348 }
  0xec   :  { %v351_v58 = vmax.f32 %v1307_v33, %v349_v57 }
  0xee   :  { %v364_v61 = vsub.f32 %v361_v55, %v351_v58  ;;  %v573_v55 = vsel %vm514_vm5, 1, %v1138_v2 }
  0xf0   :  { %v365_v62 = vmax.f32 %v364_v61, 0.0 }
  0xf2   :  { %v1399_v63 = vmul.f32 %v365_v62, %v363_v59 }
  0xf3   :  { %v368_v5 = vpop.permute.xlu1 %367 }
  0xf4   :  { %v1402_v7 = vsub.f32 %v1209_v6, %v368_v5 }
  0xf5   :  { %v716_v57 = vpop.permute.xlu0 %715 }
  0xf6   :  { %372 = vrot.lane.b32.xlu2 %v1402_v7, %s1144_s21  ;;  %v718_v58 = vsub.f32 %v1369_v26, %v716_v57 }
  0xfb   :  { %v1406_v15 = vpop.permute.xlu1 %413 }
  0xfe   :  { %418 = vperm.xlu2 %990, %v1209_v6  }
 0x103   :  { %v1409_v28 = vpop.permute.xlu1 %285 }
 0x106   :  { %992 = vset.pattern.permute.xlu2 %v1138_v2 }
 0x107   :  { %430 = vperm.xlu2 %992, %v1234_v13  }
 0x10a   :  { %v199_v53 = vpop.permute.xlu2 %198 }
 0x10b   :  { %v1413_v16 = vpop.permute.xlu1 %423  ;;  %v201_v57 = vmul.f32 %v199_v53, %v1347_v3 }
 0x10f   :  { %995 = vset.pattern.permute.xlu2 %v1137_v1 }
 0x110   :  { %445 = vperm.xlu2 %995, %v1234_v13  }
 0x114   :  { %v441_v17 = vpop.permute.xlu1 %440 }
 0x115   :  { %v443_v62 = vmin.f32 %v1332_v49, %v441_v17 }
 0x118   :  { %997 = vset.pattern.permute.xlu2 %v1143_v14 }
 0x11c   :  { %v455_v19 = vpop.permute.xlu1 %454 }
 0x11d   :  { %v457_v27 = vsub.f32 %v1234_v13, %v455_v19  ;;  %v438_v19 = vmax.f32 %v1307_v33, %v1328_v47 }
 0x11f   :  { %459 = vrot.lane.b32.xlu2 %v457_v27, %s1144_s21 }
 0x124   :  { %v1420_v29 = vpop.permute.xlu1 %488 }
 0x125   :  { %vm490_vm5 = vcmp.eq.s32.totalorder %v1420_v29, 1 }
 0x127   :  { %495 = vperm.xlu2 %997, %v1234_v13  }
 0x12d   :  { %v1423_v34 = vpop.permute.xlu1 %500 }
 0x12f   :  { %999 = vset.pattern.permute.xlu2 %v1948_v9 }
 0x130   :  { %505 = vperm.xlu2 %999, %v1234_v13  }
 0x136   :  { %v1429_v36 = vpop.permute.xlu1 %517 }
 0x138   :  { %1001 = vset.pattern.permute.xlu2 %v1139_v8 }
 0x139   :  { %522 = vperm.xlu2 %1001, %v1364_v25  }
 0x13e   :  { %v542_v38 = vpop.permute.xlu1 %541 }
 0x13f   :  { %v1439_v51 = vsub.f32 %v1364_v25, %v542_v38 }
 0x141   :  { %628 = vrot.lane.b32.xlu2 %v1436_v40, %s1134_s27  ;;  %546 = vrot.lane.b32.xlu0 %v1439_v51, %s1144_s21 }
 0x142   :  { %1003 = vset.pattern.permute.xlu2 %v1137_v1 }
 0x149   :  { %532 = vperm.xlu2 %1003, %v1364_v25   ;;  %691 = vperm.xlu0 %993, %v1369_v26  }
 0x150   :  { %v1454_v56 = vpop.permute.xlu2 %372 }
 0x151   :  { %1004 = vset.pattern.permute.xlu2 %v1138_v2  ;;  %1011 = vset.pattern.permute.xlu0 %v1143_v14 }
 0x152   :  { %575 = vperm.xlu2 %1004, %v573_v55   ;;  %147 = vperm.xlu0 %1011, %v1196_v4  }
 0x158   :  { %v1460_v59 = vpop.permute.xlu2 %418 }
 0x15a   :  { %720 = vrot.lane.b32.xlu2 %v718_v58, %s1144_s21  ;;  %408 = vperm.xlu0 %1011, %v1209_v6  }
 0x15b   :  { %1006 = vset.pattern.permute.xlu2 %v1948_v9 }
 0x161   :  { %v431_v61 = vpop.permute.xlu2 %430 }
 0x162   :  { %v433_v5 = vmax.f32 %v1325_v46, %v431_v61  ;;  %592 = vperm.xlu2 %1006, %v1364_v25   ;;  %582 = vperm.xlu0 %1011, %v1364_v25  }
 0x164   :  { %v449_v4 = vsub.f32 %v443_v62, %v433_v5  ;;  %v288_v5 = vmul.f32 %v1409_v28, %v1303_v31  ;;  %v520_v31 = vmax.f32 %v1325_v46, %v1429_v36 }
 0x166   :  { %v450_v54 = vmax.f32 %v449_v4, 0.0 }
 0x16a   :  { %v446_v38 = vpop.permute.xlu2 %445  ;;  %1008 = vset.pattern.permute.xlu2 %v1139_v8  ;;  %756 = vperm.xlu0 %1011, %v1369_v26  }
 0x16b   :  { %v448_v6 = vmin.f32 %v1305_v32, %v446_v38  ;;  %609 = vperm.xlu2 %1008, %v1436_v40  }
 0x16d   :  { %v451_v17 = vsub.f32 %v448_v6, %v438_v19  ;;  %v528_v6 = vpop.permute.xlu1 %527 }
 0x16e   :  { %v530_v28 = vmin.f32 %v1332_v49, %v528_v6 }
 0x16f   :  { %v452_v55 = vmax.f32 %v451_v17, 0.0 }
 0x170   :  { %v536_v17 = vsub.f32 %v530_v28, %v520_v31 }
 0x171   :  { %v1476_v61 = vmul.f32 %v452_v55, %v450_v54 }
 0x172   :  { %1019 = vset.pattern.permute.xlu0 %v1136_v0 }
 0x173   :  { %1010 = vset.pattern.permute.xlu2 %v1137_v1  ;;  %204 = vperm.xlu0 %1019, %v201_v57  }
 0x174   :  { %619 = vperm.xlu2 %1010, %v1436_v40  }
 0x179   :  { %v460_v47 = vpop.permute.xlu2 %459 }
 0x17a   :  { %v462_v62 = vmul.f32 %v460_v47, %v457_v27  ;;  %v537_v47 = vmax.f32 %v536_v17, 0.0 }
 0x17c   :  { %1012 = vset.pattern.permute.xlu2 %v1136_v0  ;;  %465 = vperm.xlu0 %1019, %v462_v62  }
 0x17d   :  { %291 = vperm.xlu2 %1012, %v288_v5  }
 0x181   :  { %v1484_v4 = vpop.permute.xlu2 %495 }
 0x185   :  { %701 = vperm.xlu2 %1012, %v1369_v26  }
 0x18a   :  { %v1487_v3 = vpop.permute.xlu2 %505 }
 0x193   :  { %v523_v53 = vpop.permute.xlu2 %522 }
 0x194   :  { %v525_v54 = vmax.f32 %v1307_v33, %v523_v53 }
 0x19b   :  { %v629_v19 = vpop.permute.xlu2 %628 }
 0x19c   :  { %v1490_v38 = vsub.f32 %v1436_v40, %v629_v19 }
 0x19e   :  { %633 = vrot.lane.b32.xlu1 %v1490_v38, %s1144_s21 }
 0x1a3   :  { %v533_v27 = vpop.permute.xlu2 %532 }
 0x1a4   :  { %v535_v55 = vmin.f32 %v1305_v32, %v533_v27  ;;  %v114_v27 = vmul.f32 %v1441_v52, %v1291_v24  ;;  %v1534_v52 = vsub.f32 %v1305_v32, %v1307_v33 }
 0x1a6   :  { %v538_v57 = vsub.f32 %v535_v55, %v525_v54  ;;  %587 = vperm.xlu1 %1005, %v1364_v25  }
 0x1a8   :  { %v539_v62 = vmax.f32 %v538_v57, 0.0 }
 0x1aa   :  { %v1500_v5 = vmul.f32 %v539_v62, %v537_v47 }
 0x1ac   :  { %v1502_v19 = vpop.permute.xlu2 %575 }
 0x1ae   :  { %1007 = vset.pattern.permute.xlu1 %v1138_v2 }
 0x1af   :  { %604 = vperm.xlu1 %1007, %v1436_v40  }
 0x1b3   :  { %v547_v36 = vpop.permute.xlu0 %546 }
 0x1b4   :  { %v721_v6 = vpop.permute.xlu2 %720  ;;  %v549_v55 = vmul.f32 %v547_v36, %v1439_v51 }
 0x1b5   :  { %v723_v31 = vmul.f32 %v721_v6, %v718_v58 }
 0x1b7   :  { %1009 = vset.pattern.permute.xlu1 %v1136_v0  ;;  %726 = vperm.xlu0 %1019, %v723_v31   ;;  %v375_v0 = vmul.f32 %v1454_v56, %v1402_v7 }
 0x1b8   :  { %614 = vperm.xlu1 %1009, %v1436_v40  }
 0x1bb   :  { %v1508_v53 = vpop.permute.xlu0 %691 }
 0x1bc   :  { %v1510_v28 = vpop.permute.xlu2 %592 }
 0x1bf   :  { %1020 = vset.pattern.permute.xlu0 %v1947_v12 }
 0x1c0   :  { %117 = vperm.xlu1 %1009, %v114_v27   ;;  %249 = vperm.xlu0 %1020, %v1224_v11   ;;  %v1530_v11 = vsub.f32 %v1332_v49, %v1325_v46 }
 0x1c4   :  { %v1516_v17 = vpop.permute.xlu0 %147 }
 0x1c5   :  { %v1518_v58 = vpop.permute.xlu2 %609 }
 0x1c8   :  { %378 = vperm.xlu1 %1009, %v375_v0   ;;  %510 = vperm.xlu0 %1020, %v1234_v13   ;;  %v1541_v13 = vmul.f32 %v1534_v52, %v1530_v11 }
 0x1cc   :  { %v1523_v54 = vpop.permute.xlu0 %408 }
 0x1ce   :  { %v1526_v24 = vpop.permute.xlu2 %619 }
 0x1d0   :  { %552 = vperm.xlu1 %1009, %v549_v55   ;;  %597 = vperm.xlu0 %1020, %v1364_v25   ;;  %v77_v25 = vld [vmem:[%s1945_s4 + $0xc] sm:$0x3] }
 0x1d1   :  { %vm601_vm6 = vcmp.gt.f32.partialorder %v77_v25, 0.0 }
 0x1d4   :  { %v1537_v7 = vpop.permute.xlu0 %582 }
 0x1d7   :  { %v292_v51 = vpop.permute.xlu2 %291 }
 0x1d8   :  { %v294_v56 = vadd.f32 %v292_v51, %v1541_v13  ;;  %1013 = vset.pattern.permute.xlu1 %v1139_v8  ;;  %771 = vperm.xlu0 %1020, %v1369_v26   ;;  %v660_v51 = vsel %vm601_vm6, 1, %v1138_v2 }
 0x1d9   :  { %696 = vperm.xlu1 %1013, %v1369_v26  }
 0x1da   :  { %v295_v57 = vsub.f32 %v294_v56, %v1383_v41 }
 0x1dc   :  { %v296_v47 = vmax.f32 %v295_v57, 1e-06  ;;  %v1548_v62 = vpop.permute.xlu0 %756 }
 0x1dd   :  { %1952 = vst [vmem:[#allocation11_spill] sm:$0xff] %v1548_v62 }
 0x1de   :  { %1025 = vrcp.f32 %v296_v47  ;;  %v308_v0 = vand.u32 2147483648, %v296_v47  ;;  %vm302_vm8 = vweird.f32 %v296_v47 }
 0x1e0   :  { %v309_v9 = vor.u32 1.1754944e-38, %v308_v0 }
 0x1e1   :  { %1014 = vset.pattern.permute.xlu1 %v1137_v1  ;;  %v306_v1 = vand.u32 2147483647, %v296_v47 }
 0x1e2   :  { %706 = vperm.xlu1 %1014, %v1369_v26  }
 0x1e3   :  { %vm307_vm10 = vcmp.eq.f32.partialorder %v306_v1, 8.507059e+37 }
 0x1e4   :  { %v1026_v36 = vpop.eup %1025 }
 0x1e5   :  { %v298_v8 = vmul.f32 %v1026_v36, %v296_v47  ;;  %v205_v6 = vpop.permute.xlu0 %204  ;;  %vm303_vm7 = vweird.f32 %v1026_v36 }
 0x1e6   :  { %v207_v31 = vadd.f32 %v205_v6, %v1541_v13  ;;  %vm304_vm9 = vmor %vm302_vm8, %vm303_vm7 }
 0x1e7   :  { %v299_v27 = vsub.f32 1.0, %v298_v8 }
 0x1e8   :  { %v208_v55 = vsub.f32 %v207_v31, %v1343_v60 }
 0x1e9   :  { %v300_v56 = vmul.f32 %v1026_v36, %v299_v27 }
 0x1ea   :  { %v209_v57 = vmax.f32 %v208_v55, 1e-06  ;;  %1015 = vset.pattern.permute.xlu1 %v1138_v2 }
 0x1eb   :  { %v301_v12 = vadd.f32 %v1026_v36, %v300_v56  ;;  %662 = vperm.xlu1 %1015, %v660_v51  }
 0x1ec   :  { %1027 = vrcp.f32 %v209_v57  ;;  %vm215_vm13 = vweird.f32 %v209_v57 }
 0x1ed   :  { %v305_v25 = vsel %vm304_vm9, %v1026_v36, %v301_v12 }
 0x1ee   :  { %v310_v8 = vsel %vm307_vm10, %v309_v9, %v305_v25  ;;  %v466_v6 = vpop.permute.xlu0 %465  ;;  %v221_v9 = vand.u32 2147483648, %v209_v57 }
 0x1ef   :  { %v311_v31 = vmul.f32 %v310_v8, %v1383_v41  ;;  %v468_v10 = vadd.f32 %v466_v6, %v1541_v13  ;;  %v219_v41 = vand.u32 2147483647, %v209_v57  ;;  %v1953_v6 = vmov 5  }
 0x1f0   :  { %v222_v43 = vor.u32 1.1754944e-38, %v221_v9 }
 0x1f1   :  { %v1562_v27 = vsel %vm316_vm11, %v311_v31, -1.0  ;;  %v469_v55 = vsub.f32 %v468_v10, %v1476_v61  ;;  %vm220_vm15 = vcmp.eq.f32.partialorder %v219_v41, 8.507059e+37  ;;  %vm142_vm11 = vcmp.eq.s32.totalorder %v1282_v21, 1 }
 0x1f2   :  { %v1028_v56 = vpop.eup %1027 }
 0x1f3   :  { %v211_v47 = vmul.f32 %v1028_v56, %v209_v57  ;;  %v470_v51 = vmax.f32 %v469_v55, 1e-06  ;;  %1017 = vset.pattern.permute.xlu1 %v1143_v14  ;;  %vm216_vm12 = vweird.f32 %v1028_v56 }
 0x1f4   :  { %669 = vperm.xlu1 %1017, %v1436_v40   ;;  %vm217_vm14 = vmor %vm215_vm13, %vm216_vm12  ;;  %vm403_vm12 = vcmp.eq.s32.totalorder %v1427_v35, 1 }
 0x1f5   :  { %v212_v12 = vsub.f32 1.0, %v211_v47  ;;  %1029 = vrcp.f32 %v470_v51  ;;  %v482_v47 = vand.u32 2147483648, %v470_v51  ;;  %vm476_vm2 = vweird.f32 %v470_v51 }
 0x1f7   :  { %v213_v36 = vmul.f32 %v1028_v56, %v212_v12  ;;  %v480_v12 = vand.u32 2147483647, %v470_v51 }
 0x1f9   :  { %v214_v0 = vadd.f32 %v1028_v56, %v213_v36  ;;  %vm481_vm4 = vcmp.eq.f32.partialorder %v480_v12, 8.507059e+37 }
 0x1fb   :  { %v1030_v1 = vpop.eup %1029  ;;  %v218_v25 = vsel %vm217_vm14, %v1028_v56, %v214_v0  ;;  %v483_v56 = vor.u32 1.1754944e-38, %v482_v47  ;;  %v1954_v0 = vmov 6  }
 0x1fc   :  { %v223_v10 = vsel %vm220_vm15, %v222_v43, %v218_v25  ;;  %v472_v8 = vmul.f32 %v1030_v1, %v470_v51  ;;  %1021 = vset.pattern.permute.xlu1 %v1953_v6  ;;  %vm477_vm1 = vweird.f32 %v1030_v1  ;;  %v78_v51 = vld [vmem:[%s1945_s4 + $0xe] sm:$0x3] }
 0x1fd   :  { %v224_v14 = vmul.f32 %v223_v10, %v1343_v60  ;;  %761 = vperm.xlu1 %1021, %v1369_v26   ;;  %vm478_vm3 = vmor %vm476_vm2, %vm477_vm1  ;;  %vm688_vm6 = vcmp.gt.f32.partialorder %v78_v51, 0.0 }
 0x1fe   :  { %v473_v31 = vsub.f32 1.0, %v472_v8  ;;  %v747_v10 = vsel %vm688_vm6, 1, %v1138_v2 }
 0x1ff   :  { %v1571_v55 = vsel %vm229_vm0, %v224_v14, -1.0  ;;  %v1955_v14 = vmov 7  }
 0x200   :  { %v474_v57 = vmul.f32 %v1030_v1, %v473_v31 }
 0x202   :  { %v475_v9 = vadd.f32 %v1030_v1, %v474_v57 }
 0x204   :  { %v479_v36 = vsel %vm478_vm3, %v1030_v1, %v475_v9 }
 0x205   :  { %v484_v41 = vsel %vm481_vm4, %v483_v56, %v479_v36  ;;  %1023 = vset.pattern.permute.xlu1 %v1954_v0  ;;  %v702_v56 = vpop.permute.xlu2 %701 }
 0x206   :  { %v485_v60 = vmul.f32 %v484_v41, %v1476_v61  ;;  %766 = vperm.xlu1 %1023, %v1369_v26  }
 0x208   :  { %v1577_v20 = vsel %vm490_vm5, %v485_v60, -1.0  ;;  %v704_v60 = vmin.f32 %v1332_v49, %v702_v56 }
 0x210   :  { %v634_v43 = vpop.permute.xlu1 %633 }
 0x211   :  { %v636_v25 = vmul.f32 %v634_v43, %v1490_v38 }
 0x213   :  { %639 = vperm.xlu2 %1012, %v636_v25  }
 0x218   :  { %v1583_v1 = vpop.permute.xlu1 %587 }
 0x21b   :  { %1016 = vset.pattern.permute.xlu2 %v1138_v2 }
 0x21c   :  { %749 = vperm.xlu2 %1016, %v747_v10   ;;  %v694_v10 = vmax.f32 %v1325_v46, %v1508_v53 }
 0x221   :  { %v1587_v26 = vpop.permute.xlu1 %604 }
 0x224   :  { %1018 = vset.pattern.permute.xlu2 %v1953_v6 }
 0x225   :  { %674 = vperm.xlu2 %1018, %v1436_v40  }
 0x229   :  { %v1601_v12 = vpop.permute.xlu0 %726 }
 0x22a   :  { %v1591_v29 = vpop.permute.xlu1 %614 }
 0x22d   :  { %1022 = vset.pattern.permute.xlu2 %v1954_v0 }
 0x22e   :  { %679 = vperm.xlu2 %1022, %v1436_v40  }
 0x232   :  { %v118_v61 = vpop.permute.xlu1 %117 }
 0x233   :  { %v120_v38 = vadd.f32 %v118_v61, %v1541_v13 }
 0x235   :  { %v121_v8 = vsub.f32 %v120_v38, %v1353_v18 }
 0x236   :  { %1024 = vset.pattern.permute.xlu2 %v1955_v14  ;;  %v1608_v14 = vsub.f32 %v704_v60, %v694_v10 }
 0x237   :  { %v122_v2 = vmax.f32 %v121_v8, 1e-06  ;;  %684 = vperm.xlu2 %1024, %v1436_v40  }
 0x239   :  { %1031 = vrcp.f32 %v122_v2  ;;  %v134_v43 = vand.u32 2147483648, %v122_v2  ;;  %v132_v51 = vand.u32 2147483647, %v122_v2  ;;  %vm128_vm8 = vweird.f32 %v122_v2 }
 0x23a   :  { %v379_v6 = vpop.permute.xlu1 %378 }
 0x23b   :  { %v381_v31 = vadd.f32 %v379_v6, %v1541_v13  ;;  %v135_v6 = vor.u32 1.1754944e-38, %v134_v43  ;;  %vm133_vm10 = vcmp.eq.f32.partialorder %v132_v51, 8.507059e+37 }
 0x23d   :  { %v382_v47 = vsub.f32 %v381_v31, %v1399_v63 }
 0x23f   :  { %v1032_v57 = vpop.eup %1031  ;;  %v383_v9 = vmax.f32 %v382_v47, 1e-06  ;;  %v250_v47 = vpop.permute.xlu0 %249 }
 0x240   :  { %v124_v36 = vmul.f32 %v1032_v57, %v122_v2  ;;  %vm129_vm7 = vweird.f32 %v1032_v57  ;;  %v711_v2 = vmax.f32 %v1608_v14, 0.0 }
 0x241   :  { %1033 = vrcp.f32 %v383_v9  ;;  %vm130_vm9 = vmor %vm128_vm8, %vm129_vm7  ;;  %v395_v62 = vand.u32 2147483648, %v383_v9  ;;  %vm389_vm13 = vweird.f32 %v383_v9 }
 0x242   :  { %v125_v41 = vsub.f32 1.0, %v124_v36  ;;  %v553_v0 = vpop.permute.xlu1 %552 }
 0x243   :  { %v555_v40 = vadd.f32 %v553_v0, %v1541_v13  ;;  %v393_v0 = vand.u32 2147483647, %v383_v9  ;;  %v396_v51 = vor.u32 1.1754944e-38, %v395_v62 }
 0x244   :  { %v126_v25 = vmul.f32 %v1032_v57, %v125_v41 }
 0x245   :  { %v556_v61 = vsub.f32 %v555_v40, %v1500_v5  ;;  %vm1617_vm0 = vcmp.eq.f32.partialorder %v393_v0, 8.507059e+37 }
 0x246   :  { %v127_v38 = vadd.f32 %v1032_v57, %v126_v25 }
 0x247   :  { %v1034_v8 = vpop.eup %1033  ;;  %v1610_v31 = vmax.f32 %v556_v61, 1e-06 }
 0x248   :  { %v131_v56 = vsel %vm130_vm9, %v1032_v57, %v127_v38  ;;  %v385_v36 = vmul.f32 %v1034_v8, %v383_v9  ;;  %vm390_vm14 = vweird.f32 %v1034_v8 }
 0x249   :  { %v136_v41 = vsel %vm133_vm10, %v135_v6, %v131_v56  ;;  %1035 = vrcp.f32 %v1610_v31  ;;  %vm563_vm1 = vweird.f32 %v1610_v31  ;;  %vm391_vm2 = vmor %vm389_vm13, %vm390_vm14  ;;  %v569_v6 = vand.u32 2147483648, %v1610_v31 }
 0x24a   :  { %v137_v53 = vmul.f32 %v136_v41, %v1353_v18  ;;  %v386_v40 = vsub.f32 1.0, %v385_v36  ;;  %v567_v18 = vand.u32 2147483647, %v1610_v31  ;;  %vm577_vm10 = vcmp.eq.s32.totalorder %v1502_v19, 1 }
 0x24b   :  { %v697_v60 = vpop.permute.xlu1 %696 }
 0x24c   :  { %v143_v43 = vsel %vm142_vm11, %v137_v53, -1.0  ;;  %v387_v25 = vmul.f32 %v1034_v8, %v386_v40  ;;  %v699_v56 = vmax.f32 %v1307_v33, %v697_v60  ;;  %v511_v60 = vpop.permute.xlu0 %510  ;;  %vm1665_vm6 = vcmp.eq.f32.partialorder %v567_v18, 8.507059e+37 }
 0x24d   :  { %vm144_vm15 = vcmp.gt.f32.partialorder %v143_v43, -1.0 }
 0x24e   :  { %v388_v10 = vadd.f32 %v1034_v8, %v387_v25  ;;  %v145_v21 = vsel %vm144_vm15, %v143_v43, -1.0  ;;  %v165_v61 = vsel %vm144_vm15, %v1321_v44, 0.0  ;;  %v150_v9 = vsel %vm144_vm15, %v1516_v17, 0.0 }
 0x24f   :  { %v1036_v38 = vpop.eup %1035  ;;  %vm1631_vm3 = vcmp.gt.f32.partialorder %v1571_v55, %v145_v21  ;;  %v155_v36 = vsel %vm144_vm15, %v1314_v37, 0.0  ;;  %v160_v0 = vsel %vm144_vm15, %v1288_v23, 0.0 }
 0x250   :  { %v392_v41 = vsel %vm391_vm2, %v1034_v8, %v388_v10  ;;  %v559_v44 = vmul.f32 %v1036_v38, %v1610_v31  ;;  %v232_v17 = vsel %vm1631_vm3, %v1571_v55, %v145_v21  ;;  %v252_v40 = vsel %vm1631_vm3, %v250_v47, %v165_v61 }
 0x251   :  { %v397_v53 = vsel %vm1617_vm0, %v396_v51, %v392_v41  ;;  %vm318_vm4 = vcmp.gt.f32.partialorder %v1562_v27, %v232_v17  ;;  %v237_v37 = vsel %vm1631_vm3, %v1316_v39, %v150_v9  ;;  %vm564_vm5 = vweird.f32 %v1036_v38 }
 0x252   :  { %v398_v8 = vmul.f32 %v397_v53, %v1399_v63  ;;  %v560_v25 = vsub.f32 1.0, %v559_v44  ;;  %v339_v55 = vsel %vm318_vm4, %v1389_v48, %v252_v40  ;;  %v319_v23 = vsel %vm318_vm4, %v1562_v27, %v232_v17  ;;  %vm565_vm8 = vmor %vm563_vm1, %vm564_vm5 }
 0x253   :  { %v324_v43 = vsel %vm318_vm4, %v1385_v42, %v237_v37  ;;  %v242_v47 = vsel %vm1631_vm3, %v1359_v22, %v155_v36  ;;  %v247_v57 = vsel %vm1631_vm3, %v1323_v45, %v160_v0  ;;  %v570_v42 = vor.u32 1.1754944e-38, %v569_v6 }
 0x254   :  { %v404_v39 = vsel %vm403_vm12, %v398_v8, -1.0  ;;  %v561_v63 = vmul.f32 %v1036_v38, %v560_v25  ;;  %v707_v51 = vpop.permute.xlu1 %706  ;;  %v329_v48 = vsel %vm318_vm4, %v1378_v30, %v242_v47  ;;  %v334_v27 = vsel %vm318_vm4, %v1392_v50, %v247_v57  ;;  %v1752_v8 = vld [vmem:[%s1943_s2] sm:$0x3]  ;;  %s1146_s2 = smov [#allocation7]  }
 0x255   :  { %v709_v22 = vmin.f32 %v1305_v32, %v707_v51  ;;  %vm1670_vm7 = vcmp.gt.f32.partialorder %v404_v39, %v319_v23  ;;  %v729_v41 = vadd.f32 %v1601_v12, %v1541_v13  ;;  %v612_v44 = vmax.f32 %v1307_v33, %v1518_v58  ;;  %s929_s9 = sshll.u32 %s1146_s2, 4  ;;  %s930_s9 = int_to_ptr.vmem [resolvable:$true] %s929_s9 }
 0x256   :  { %v562_v45 = vadd.f32 %v1036_v38, %v561_v63  ;;  %v406_v35 = vsel %vm1670_vm7, %v404_v39, %v319_v23  ;;  %v426_v30 = vsel %vm1670_vm7, %v1413_v16, %v339_v55  ;;  %v411_v50 = vsel %vm1670_vm7, %v1523_v54, %v324_v43 }
 0x257   :  { %v712_v18 = vsub.f32 %v709_v22, %v699_v56  ;;  %vm492_vm9 = vcmp.gt.f32.partialorder %v1577_v20, %v406_v35  ;;  %v416_v61 = vsel %vm1670_vm7, %v1406_v15, %v329_v48  ;;  %v421_v9 = vsel %vm1670_vm7, %v1460_v59, %v334_v27 }
 0x258   :  { %v566_v16 = vsel %vm565_vm8, %v1036_v38, %v562_v45  ;;  %v1692_v6 = vsel %vm492_vm9, %v511_v60, %v426_v30  ;;  %v493_v54 = vsel %vm492_vm9, %v1577_v20, %v406_v35  ;;  %v1696_v62 = vsel %vm492_vm9, %v1484_v4, %v411_v50  ;;  %v1712_v4 = vpop.permute.xlu0 %597 }
 0x259   :  { %v571_v31 = vsel %vm1665_vm6, %v570_v42, %v566_v16  ;;  %v713_v56 = vmax.f32 %v712_v18, 0.0  ;;  %v1701_v36 = vsel %vm492_vm9, %v1423_v34, %v416_v61  ;;  %v1704_v15 = vsel %vm492_vm9, %v1487_v3, %v421_v9 }
 0x25a   :  { %v572_v59 = vmul.f32 %v571_v31, %v1500_v5  ;;  %v622_v17 = vmin.f32 %v1305_v32, %v1526_v24  ;;  %v607_v0 = vmax.f32 %v1325_v46, %v1587_v26  ;;  %v617_v53 = vmin.f32 %v1332_v49, %v1591_v29 }
 0x25b   :  { %v1710_v20 = vmul.f32 %v713_v56, %v711_v2  ;;  %v1755_v33 = vmax.f32 %v1530_v11, 1e-06  ;;  %v793_v32 = vand.u32 2147483647, %v1752_v8  ;;  %v1761_v49 = vmax.f32 %v1534_v52, 1e-06 }
 0x25c   :  { %v578_v38 = vsel %vm577_vm10, %v572_v59, -1.0  ;;  %v625_v60 = vsub.f32 %v622_v17, %v612_v44  ;;  %v623_v37 = vsub.f32 %v617_v53, %v607_v0 }
 0x25d   :  { %vm1716_vm11 = vcmp.gt.f32.partialorder %v578_v38, %v493_v54  ;;  %v730_v12 = vsub.f32 %v729_v41, %v1710_v20  ;;  %v1758_v26 = vpop.permute.xlu1 %662  ;;  %v794_v55 = vsub.f32 0.0, %v793_v32  ;;  %vm813_vm2 = vweird.f32 %v1755_v33 }
 0x25e   :  { %v600_v3 = vsel %vm1716_vm11, %v1712_v4, %v1692_v6  ;;  %v1726_v5 = vsel %vm1716_vm11, %v578_v38, %v493_v54  ;;  %v585_v19 = vsel %vm1716_vm11, %v1537_v7, %v1696_v62  ;;  %v590_v14 = vsel %vm1716_vm11, %v1583_v1, %v1701_v36 }
 0x25f   :  { %v595_v2 = vsel %vm1716_vm11, %v1510_v28, %v1704_v15  ;;  %v731_v40 = vmax.f32 %v730_v12, 1e-06  ;;  %v626_v58 = vmax.f32 %v625_v60, 0.0  ;;  %v624_v24 = vmax.f32 %v623_v37, 0.0 }
 0x260   :  { %v795_v39 = vmul.f32 1.442695, %v794_v55  ;;  %vm664_vm15 = vcmp.eq.s32.totalorder %v1758_v26, 1  ;;  %v803_v12 = vmul.f32 0.5, %v1530_v11  ;;  %v819_v60 = vand.u32 2147483648, %v1755_v33 }
 0x261   :  { %1037 = vrcp.f32 %v731_v40  ;;  %v1766_v23 = vmul.f32 %v626_v58, %v624_v24  ;;  %v741_v45 = vand.u32 2147483647, %v731_v40  ;;  %v743_v35 = vand.u32 2147483648, %v731_v40 }
 0x262   :  { %1039 = vrcp.f32 %v1755_v33  ;;  %vm737_vm12 = vweird.f32 %v731_v40  ;;  %v817_v24 = vand.u32 2147483647, %v1755_v33  ;;  %v805_v55 = vmul.f32 0.5, %v1534_v52 }
 0x263   :  { %1041 = vrcp.f32 %v1761_v49  ;;  %vm1787_vm14 = vcmp.eq.f32.partialorder %v741_v45, 8.507059e+37  ;;  %v744_v56 = vor.u32 1.1754944e-38, %v743_v35  ;;  %vm829_vm6 = vweird.f32 %v1761_v49 }
 0x264   :  { %v790_v62 = vmax.f32 %v1752_v8, 0.0 }
 0x266   :  { %v1774_v27 = vpop.permute.xlu1 %669 }
 0x267   :  { %v1764_v29 = vpop.eup %1037 }
 0x268   :  { %v733_v57 = vmul.f32 %v1764_v29, %v731_v40  ;;  %v1772_v63 = vpop.eup %1039  ;;  %vm738_vm13 = vweird.f32 %v1764_v29 }
 0x269   :  { %v1776_v10 = vpop.eup %1041  ;;  %vm1800_vm1 = vmor %vm737_vm12, %vm738_vm13  ;;  %vm814_vm3 = vweird.f32 %v1772_v63  ;;  %vm1840_vm13 = vcmp.eq.f32.partialorder %v817_v24, 8.507059e+37 }
 0x26a   :  { %v734_v48 = vsub.f32 1.0, %v733_v57  ;;  %v825_v21 = vmul.f32 %v1776_v10, %v1761_v49  ;;  %vm830_vm7 = vweird.f32 %v1776_v10  ;;  %vm1820_vm9 = vmor %vm813_vm2, %vm814_vm3  ;;  %v833_v57 = vand.u32 2147483647, %v1761_v49 }
 0x26b   :  { %vm1832_vm12 = vmor %vm829_vm6, %vm830_vm7  ;;  %vm886_vm7 = vcmask 1041408  }
 0x26c   :  { %v735_v22 = vmul.f32 %v1764_v29, %v734_v48  ;;  %v826_v16 = vsub.f32 1.0, %v825_v21  ;;  %v835_v48 = vand.u32 2147483648, %v1761_v49 }
 0x26d   :  { %v640_v25 = vpop.permute.xlu2 %639 }
 0x26e   :  { %v642_v43 = vadd.f32 %v640_v25, %v1541_v13  ;;  %v809_v13 = vmul.f32 %v1772_v63, %v1755_v33  ;;  %v736_v9 = vadd.f32 %v1764_v29, %v735_v22  ;;  %v827_v32 = vmul.f32 %v1776_v10, %v826_v16 }
 0x26f   :  { %v1794_v44 = vpop.permute.xlu1 %761  ;;  %v804_v22 = vadd.f32 %v803_v12, %v1325_v46 }
 0x270   :  { %v643_v47 = vsub.f32 %v642_v43, %v1766_v23  ;;  %v810_v30 = vsub.f32 1.0, %v809_v13  ;;  %v740_v11 = vsel %vm1800_vm1, %v1764_v29, %v736_v9  ;;  %v828_v52 = vadd.f32 %v1776_v10, %v827_v32 }
 0x271   :  { %v745_v43 = vsel %vm1787_vm14, %v744_v56, %v740_v11  ;;  %vm1846_vm14 = vcmp.eq.f32.partialorder %v833_v57, 8.507059e+37  ;;  %v836_v9 = vor.u32 1.1754944e-38, %v835_v48  ;;  %v864_v56 = vld [vmem:[#allocation5 + $0x4] sm:$0x3] }
 0x272   :  { %v644_v51 = vmax.f32 %v643_v47, 1e-06  ;;  %v811_v59 = vmul.f32 %v1772_v63, %v810_v30  ;;  %v746_v21 = vmul.f32 %v745_v43, %v1710_v20 }
 0x274   :  { %1043 = vrcp.f32 %v644_v51  ;;  %v656_v38 = vand.u32 2147483648, %v644_v51  ;;  %v654_v0 = vand.u32 2147483647, %v644_v51  ;;  %vm650_vm4 = vweird.f32 %v644_v51 }
 0x275   :  { %1045 = vpow2.f32 %v795_v39  ;;  %v812_v40 = vadd.f32 %v1772_v63, %v811_v59  ;;  %v1145_v59 = vmov 0.0  }
 0x276   :  { %v1780_v42 = vpop.permute.xlu2 %749  ;;  %1047 = vlog2.f32 %v1755_v33  ;;  %v657_v25 = vor.u32 1.1754944e-38, %v656_v38  ;;  %vm655_vm8 = vcmp.eq.f32.partialorder %v654_v0, 8.507059e+37 }
 0x277   :  { %vm751_vm10 = vcmp.eq.s32.totalorder %v1780_v42, 1  ;;  %v816_v45 = vsel %vm1820_vm9, %v1772_v63, %v812_v40  ;;  %v1053_v42 = vld [vmem:[#allocation2 + $0x2] sm:$0x3] }
 0x278   :  { %v806_v30 = vadd.f32 %v1053_v42, %v805_v55  ;;  %v752_v63 = vsel %vm751_vm10, %v746_v21, -1.0  ;;  %v767_v16 = vpop.permute.xlu1 %766  ;;  %v772_v42 = vpop.permute.xlu0 %771  ;;  %vm918_vm10 = vcmask 1040384  }
 0x27a   :  { %v1044_v50 = vpop.eup %1043 }
 0x27b   :  { %v1046_v18 = vpop.eup %1045  ;;  %v646_v61 = vmul.f32 %v1044_v50, %v644_v51  ;;  %vm651_vm0 = vweird.f32 %v1044_v50 }
 0x27c   :  { %v797_v41 = vadd.f32 1.0, %v1046_v18  ;;  %vm652_vm5 = vmor %vm650_vm4, %vm651_vm0  ;;  %v1048_v39 = vpop.eup %1047 }
 0x27d   :  { %v647_v54 = vsub.f32 1.0, %v646_v61  ;;  %v840_v18 = vmul.f32 0.6931472, %v1048_v39  ;;  %v832_v61 = vsel %vm1832_vm12, %v1776_v10, %v828_v52  ;;  %vm921_vm12 = vcmask 1042432  }
 0x27e   :  { %1049 = vlog2.f32 %v797_v41  ;;  %v845_v41 = vld [vmem:[#allocation5] sm:$0x3] }
 0x27f   :  { %v648_v17 = vmul.f32 %v1044_v50, %v647_v54  ;;  %v675_v37 = vpop.permute.xlu2 %674  ;;  %1051 = vlog2.f32 %v1761_v49  ;;  %v837_v49 = vsel %vm1846_vm14, %v836_v9, %v832_v61  ;;  %v874_v61 = vld [vmem:[#allocation5 + $0x6] sm:$0x3] }
 0x281   :  { %v649_v58 = vadd.f32 %v1044_v50, %v648_v17 }
 0x283   :  { %v653_v29 = vsel %vm652_vm5, %v1044_v50, %v649_v58 }
 0x284   :  { %v658_v51 = vsel %vm655_vm8, %v657_v25, %v653_v29  ;;  %v1050_v36 = vpop.eup %1049 }
 0x285   :  { %v659_v13 = vmul.f32 %v658_v51, %v1766_v23  ;;  %v820_v23 = vor.u32 1.1754944e-38, %v819_v60  ;;  %v799_v0 = vmul.f32 0.6931472, %v1050_v36  ;;  %v854_v60 = vld [vmem:[#allocation5 + $0x2] sm:$0x3]  ;;  %v1052_v32 = vpop.eup %1051 }
 0x286   :  { %v843_v21 = vmul.f32 0.6931472, %v1052_v32 }
 0x287   :  { %v665_v46 = vsel %vm664_vm15, %v659_v13, -1.0  ;;  %v821_v1 = vsel %vm1840_vm13, %v820_v23, %v816_v45 }
 0x288   :  { %vm1851_vm0 = vcmp.gt.f32.partialorder %v665_v46, %v1726_v5  ;;  %v680_v26 = vpop.permute.xlu2 %679 }
 0x289   :  { %v667_v54 = vsel %vm1851_vm0, %v665_v46, %v1726_v5  ;;  %v672_v31 = vsel %vm1851_vm0, %v1774_v27, %v585_v19  ;;  %v677_v10 = vsel %vm1851_vm0, %v675_v37, %v590_v14  ;;  %v682_v7 = vsel %vm1851_vm0, %v680_v26, %v595_v2  ;;  %v1982_v14 = vld [vmem:[#allocation11_spill] sm:$0xff] }
 0x28a   :  { %vm1884_vm15 = vcmp.gt.f32.partialorder %v752_v63, %v667_v54 }
 0x28b   :  { %v754_v19 = vsel %vm1884_vm15, %v752_v63, %v667_v54  ;;  %v759_v28 = vsel %vm1884_vm15, %v1982_v14, %v672_v31  ;;  %v764_v15 = vsel %vm1884_vm15, %v1794_v44, %v677_v10  ;;  %v769_v2 = vsel %vm1884_vm15, %v767_v16, %v682_v7 }
 0x28c   :  { %vm781_vm1 = vcmp.gt.f32.partialorder %v754_v19, 0.7  ;;  %vm783_vm2 = vcmp.lt.f32.partialorder %v754_v19, 0.3  ;;  %v807_v27 = vsub.f32 %v759_v28, %v804_v22  ;;  %vm784_vm3 = vcmp.ge.f32.partialorder %v754_v19, 0.0 }
 0x28d   :  { %v1904_v38 = vsel %vm781_vm1, 1.0, %v1145_v59  ;;  %v823_v12 = vsub.f32 %v764_v15, %v806_v30  ;;  %v841_v17 = vsub.f32 %v769_v2, %v840_v18  ;;  %vm785_vm4 = vmand %vm783_vm2, %vm784_vm3 }
 0x28e   :  { %v791_v44 = vmul.f32 %v1752_v8, %v1904_v38  ;;  %v822_v53 = vmul.f32 %v821_v1, %v807_v27  ;;  %vm787_vm5 = vmor %vm781_vm1, %vm785_vm4  ;;  %v911_v34 = vsel %vm886_vm7, %v1904_v38, 0.0 }
 0x28f   :  { %v838_v37 = vmul.f32 %v837_v49, %v823_v12  ;;  %v865_v11 = vsub.f32 %v864_v56, %v841_v17  ;;  %v947_v35 = vsel %vm787_vm5, 1.0, %v1145_v59  ;;  %v912_v1 = vrot.slane %v911_v34, 4 }
 0x290   :  { %v792_v58 = vsub.f32 %v790_v62, %v791_v44  ;;  %v846_v40 = vsub.f32 %v845_v41, %v822_v53  ;;  %v896_v26 = vsel %vm886_vm7, %v947_v35, 0.0 }
 0x291   :  { %v855_v24 = vsub.f32 %v854_v60, %v838_v37  ;;  %v866_v57 = vand.u32 2147483647, %v865_v11  ;;  %v868_v39 = vmul.f32 0.5, %v865_v11  ;;  %v685_v13 = vpop.permute.xlu2 %684  ;;  %v897_v20 = vrot.slane %v896_v26, 4 }
 0x292   :  { %v800_v25 = vadd.f32 %v799_v0, %v792_v58  ;;  %v847_v55 = vand.u32 2147483647, %v846_v40  ;;  %v849_v29 = vmul.f32 0.5, %v846_v40  ;;  %v687_v18 = vsel %vm1851_vm0, %v685_v13, %v600_v3 }
 0x293   :  { %v856_v43 = vand.u32 2147483647, %v855_v24  ;;  %v858_v47 = vmul.f32 0.5, %v855_v24  ;;  %vm867_vm9 = vcmp.lt.f32.partialorder %v866_v57, 1.0  ;;  %v869_v30 = vmul.f32 %v868_v39, %v865_v11 }
 0x294   :  { %v885_v8 = vsel %vm787_vm5, %v800_v25, 0.0  ;;  %vm1910_vm6 = vcmp.lt.f32.partialorder %v847_v55, 1.0  ;;  %v850_v52 = vmul.f32 %v849_v29, %v846_v40  ;;  %v942_v48 = vadd.f32 -0.5, %v847_v55 }
 0x295   :  { %vm1914_vm8 = vcmp.lt.f32.partialorder %v856_v43, 1.0  ;;  %v859_v33 = vmul.f32 %v858_v47, %v855_v24  ;;  %v887_v45 = vsel %vm886_vm7, %v885_v8, 0.0  ;;  %v943_v23 = vadd.f32 -0.5, %v856_v43 }
 0x296   :  { %v852_v46 = vsel %vm1910_vm6, %v850_v52, %v942_v48  ;;  %v944_v50 = vadd.f32 -0.5, %v866_v57  ;;  %v774_v9 = vsel %vm1884_vm15, %v772_v42, %v687_v18  ;;  %v888_v31 = vrot.slane %v887_v45, 4 }
 0x297   :  { %v861_v63 = vsel %vm1914_vm8, %v859_v33, %v943_v23  ;;  %v844_v54 = vsub.f32 %v774_v9, %v843_v21  ;;  %v898_v19 = vadd.f32 %v897_v20, %v896_v26  ;;  %v913_v15 = vadd.f32 %v912_v1, %v911_v34 }
 0x298   :  { %v862_v16 = vadd.f32 %v861_v63, %v852_v46  ;;  %v871_v10 = vsel %vm867_vm9, %v869_v30, %v944_v50  ;;  %v889_v62 = vadd.f32 %v888_v31, %v887_v45 }
 0x299   :  { %v875_v4 = vsub.f32 %v874_v61, %v844_v54  ;;  %v899_v27 = vrot.slane %v898_v19, 2  ;;  %v914_v59 = vrot.slane %v913_v15, 2 }
 0x29a   :  { %v872_v6 = vadd.f32 %v871_v10, %v862_v16  ;;  %v890_v28 = vrot.slane %v889_v62, 2 }
 0x29b   :  { %v876_v3 = vand.u32 2147483647, %v875_v4  ;;  %v878_v7 = vmul.f32 0.5, %v875_v4  ;;  %v900_v17 = vadd.f32 %v899_v27, %v898_v19  ;;  %v915_v53 = vadd.f32 %v914_v59, %v913_v15 }
 0x29c   :  { %v891_v56 = vadd.f32 %v890_v28, %v889_v62 }
 0x29d   :  { %vm877_vm11 = vcmp.lt.f32.partialorder %v876_v3, 1.0  ;;  %v879_v36 = vmul.f32 %v878_v7, %v875_v4  ;;  %v945_v5 = vadd.f32 -0.5, %v876_v3  ;;  %v901_v37 = vrot.slane %v900_v17, 1 }
 0x29e   :  { %v892_v44 = vrot.slane %v891_v56, 1  ;;  %v916_v58 = vrot.slane %v915_v53, 1 }
 0x29f   :  { %v881_v14 = vsel %vm877_vm11, %v879_v36, %v945_v5  ;;  %v902_v24 = vadd.f32 %v901_v37, %v900_v17 }
 0x2a0   :  { %v882_v2 = vadd.f32 %v881_v14, %v872_v6  ;;  %v893_v32 = vadd.f32 %v892_v44, %v891_v56  ;;  %v917_v25 = vadd.f32 %v916_v58, %v915_v53 }
 0x2a2   :  { %v903_v49 = vmul.f32 %v882_v2, %v1904_v38  ;;  %v919_v55 = vsel %vm918_vm10, %v893_v32, %v902_v24 }
 0x2a4   :  { %v904_v41 = vsel %vm886_vm7, %v903_v49, 0.0 }
 0x2a5   :  { %v905_v12 = vrot.slane %v904_v41, 4 }
 0x2a7   :  { %v906_v0 = vadd.f32 %v905_v12, %v904_v41 }
 0x2a9   :  { %v907_v60 = vrot.slane %v906_v0, 2 }
 0x2ab   :  { %v908_v11 = vadd.f32 %v907_v60, %v906_v0 }
 0x2ad   :  { %v909_v40 = vrot.slane %v908_v11, 1 }
 0x2af   :  { %v910_v38 = vadd.f32 %v909_v40, %v908_v11 }
 0x2b1   :  { %v920_v29 = vsel %vm886_vm7, %v919_v55, %v910_v38 }
 0x2b2   :  { %v922_v43 = vsel %vm921_vm12, %v920_v29, %v917_v25 }
 0x2b3   :  { %923 = vst [vmem:[#allocation7] sm:$0xf] %v922_v43 }
 0x2b4   :  { %934 = dma.vmem_to_hbm [thread:$0]  %s930_s9, 64, %s932_s12, [#allocation4]  }
 0x2b5   :  { %1130 = dma.done.wait [#allocation4], 64  }
 0x2b6   :  { %1131 = vsyncadd [#allocation4], 4294967232 }
 0x2b7   :  { %939 = vsyncpa [#allocation3], 1 }
 0x2b8   :  { %940 = vsyncpa [#allocation6], 1 }
 0x2b9   :  { %941 = vsyncpa [#allocation4], 1 }

</bundles_post_ra>
